<compile_context>
chip_gen: v7x
topology: tpu7x:2x2x1
jax: 0.10.0
libtpu: 0.0.40
codegen_flags: <defaults>
</compile_context>

<pallas_src>
import functools

import numpy as np
import jax
import jax.numpy as jnp
from jax.experimental import pallas as pl
from jax.experimental.pallas import tpu as pltpu

_MXU_DTYPE = jnp.float32   # set to jnp.bfloat16 on v6e/v7x (accumulation stays f32)
_BN_EPS = 1e-5
_OUT_LANES = 128           # pad final conv's output channels to a lane-dense width

# Static pipeline description, in module order.
# (kind, k, pad_or_stride, cin, cout, relu, has_bn); "pool" entries are parameter-free.
_LAYERS = (
    ("conv",   3, 0, 76, 32, True,  True),   # conv1_1 + bn1_1 + relu1_1
    ("conv",   3, 0, 32, 32, True,  True),   # conv1_2 + bn1_2 + relu1_2
    ("pool",   2, 2,  0,  0, False, False),  # maxpool1 (k=2, stride=2)
    ("conv",   3, 0, 32, 64, True,  True),   # conv2_1 + bn2_1 + relu2_1
    ("conv",   3, 0, 64, 64, True,  True),   # conv2_2 + bn2_2 + relu2_2
    ("pool",   2, 2,  0,  0, False, False),  # maxpool2 (k=2, stride=2)
    ("deconv", 3, 1, 64, 32, True,  True),   # deconv1 + bn1 + relu1   (stride 1)
    ("deconv", 2, 2, 32, 32, True,  True),   # deconv2 + bn2 + relu2   (stride 2)
    ("deconv", 2, 2, 32, 64, True,  True),   # deconv3 + bn3 + relu3   (stride 2)
    ("deconv", 5, 1, 64, 64, True,  True),   # deconv4 + bn4 + relu4   (stride 1)
    ("conv",   3, 1, 64, 64, False, True),   # conv1 + conv_bn1        (NO relu)
    ("conv",   1, 0, 64, 76, False, False),  # conv2                   (bias only)
)


# ----------------------------------------------------------------------------
# In-kernel helpers (slices, concats, adds, max, 2-D dots only -- robust lowering)
# ----------------------------------------------------------------------------
def _shift_rows(x, s):
    """Block-level row shift with zero fill: y[j] = x[j - s] (0 if out of range)."""
    if s == 0:
        return x
    r, c = x.shape
    fill = jnp.zeros((abs(s), c), x.dtype)
    if s > 0:
        return jnp.concatenate([fill, x[: r - s, :]], axis=0)
    return jnp.concatenate([x[-s:, :], fill], axis=0)


def _matmul(a, b):
    return jnp.dot(a.astype(_MXU_DTYPE), b.astype(_MXU_DTYPE),
                   preferred_element_type=jnp.float32)


def _conv_like(x, p, *, k, pad, relu, pre_mask, tap_masks):
    """Conv1d with padding `pad` (stride-1 ConvTranspose comes pre-flipped/packed).

    x: (R, cin) stripes of length S per sample; p: (k*cin + 1, cout), last row = bias.
    out[j] = sum_t x[j + t - pad] @ p[t*cin:(t+1)*cin]  (+ bias, optional ReLU).
    """
    cin = x.shape[1]
    if pre_mask is not None:                     # zero rows beyond the valid length
        x = x * pre_mask
    pieces = []
    for t in range(k):
        xt = _shift_rows(x, pad - t)
        m = tap_masks.get(t)
        if m is not None:                        # zero-padding at stripe edges
            xt = xt * m
        pieces.append(xt)
    xc = pieces[0] if k == 1 else jnp.concatenate(pieces, axis=-1)   # (R, k*cin)
    y = _matmul(xc, p[: k * cin, :]) + p[k * cin: k * cin + 1, :]
    return jnp.maximum(y, 0.0) if relu else y


def _pool_k2(x, e_mat):
    """MaxPool1d(k=2): pairwise max then per-stripe stride-2 gather (host-built E)."""
    m = jnp.maximum(x, _shift_rows(x, -1))       # m[j] = max(x[j], x[j+1])
    return _matmul(e_mat, m)


def _deconv_s2(x, p, z0_mat, *, relu):
    """ConvTranspose1d(k=2, stride=2): out[2i] = x[i]@W0, out[2i+1] = x[i]@W1.

    p: (cin + 1, 2*cout) = [[W0 | W1]; [b | b]].  Z0 is the per-stripe zero-insert
    scatter (out row 2i <- row i); the odd half is the same scatter shifted by one row.
    """
    cin = x.shape[1]
    cout = p.shape[1] // 2
    pq = _matmul(x, p[:cin, :])                  # (R, 2*cout) = [P0 | P1]
    q = _matmul(z0_mat, pq)                      # zero-insert upsample of both halves
    y = q[:, :cout] + _shift_rows(q[:, cout:], 1)
    y = y + p[cin: cin + 1, :cout]
    return jnp.maximum(y, 0.0) if relu else y


# ----------------------------------------------------------------------------
# Fused kernel: B samples per grid step, the full 12-layer pipeline in VMEM/vregs
# ----------------------------------------------------------------------------
def _tsconvdeconv_kernel(meta, x_ref, e_ref, z_ref, m_ref, *refs):
    o_ref = refs[-1]
    p_refs = refs[:-1]
    x = x_ref[...]
    e_mat = e_ref[...]
    z0_mat = z_ref[...]
    masks = m_ref[...]
    pi = 0
    for entry in meta:
        kind = entry[0]
        if kind == "pool":
            x = _pool_k2(x, e_mat)
        elif kind == "conv":
            _, k, pad, relu, pre_col, tap_cols = entry
            pre_mask = masks[:, pre_col:pre_col + 1] if pre_col >= 0 else None
            tmasks = {t: masks[:, c:c + 1] for (t, c) in tap_cols}
            x = _conv_like(x, p_refs[pi][...], k=k, pad=pad, relu=relu,
                           pre_mask=pre_mask, tap_masks=tmasks)
            pi += 1
        else:  # "dc2"
            _, relu = entry
            x = _deconv_s2(x, p_refs[pi][...], z0_mat, relu=relu)
            pi += 1
    o_ref[...] = x.astype(o_ref.dtype)


# ----------------------------------------------------------------------------
# Static plan / host-side constants / parameter packing
# ----------------------------------------------------------------------------
def _build_plan(length, stripe):
    """Static per-layer kernel meta + list of mask column specs + final length."""
    meta, mask_specs = [], []

    def col(spec):
        if spec not in mask_specs:
            mask_specs.append(spec)
        return mask_specs.index(spec)

    l = length
    for (kind, k, sp, _cin, _cout, relu, _bn) in _LAYERS:
        if kind == "pool":
            assert l % 2 == 0, "odd pre-pool length not supported (PyTorch floors)"
            meta.append(("pool",))
            l = l // 2
            continue
        if kind == "deconv" and sp != 1:
            assert k == 2 and sp == 2
            meta.append(("dc2", relu))
            l = (l - 1) * sp + k
            continue
        # conv with padding, or stride-1 ConvTranspose expressed as padded conv
        pad = sp if kind == "conv" else (k - 1)
        pre_col, tap_cols = -1, ()
        if pad > 0:
            if l < stripe:
                assert l + pad <= stripe
                pre_col = col(("lt", l))           # zero rows >= valid length
            else:
                assert l == stripe and pad == 1
                tap_cols = ((0, col(("ne", 0))), (k - 1, col(("ne", stripe - 1))))
        lout = l + 2 * pad - k + 1
        assert 0 < lout <= stripe
        meta.append(("conv", k, pad, relu, pre_col, tap_cols))
        l = lout
    if not mask_specs:
        mask_specs.append(("lt", stripe))
    return tuple(meta), tuple(mask_specs), l


def _build_constants(bblk, stripe, mask_specs):
    """Host-precomputed selection matrices and masks (no in-kernel iota/compare)."""
    r = bblk * stripe
    row = np.arange(r)[:, None]
    colv = np.arange(r)[None, :]
    same = (row // stripe) == (colv // stripe)
    ri, ci = row % stripe, colv % stripe
    e_mat = (same & (ri < stripe // 2) & (ci == 2 * ri)).astype(np.float32)   # pool gather
    z0_mat = (same & (ci < stripe // 2) & (ri == 2 * ci)).astype(np.float32)  # deconv scatter
    pos = np.arange(r) % stripe
    cols = []
    for spec in mask_specs:
        if spec[0] == "lt":
            cols.append((pos < spec[1]).astype(np.float32))
        else:
            cols.append((pos != spec[1]).astype(np.float32))
    masks = np.stack(cols, axis=1)
    return jnp.asarray(e_mat), jnp.asarray(z0_mat), jnp.asarray(masks)


def init_params(key):
    """Logical params with eval-mode BN folded.  Tap layout w[t, ci, co]:
         Conv1d weight (Cout, Cin, k)          -> w[t, ci, co] = W[co, ci, t]
         ConvTranspose1d weight (Cin, Cout, k) -> w[t, ci, co] = W[ci, co, t]
    """
    params = []
    for (kind, k, sp, cin, cout, relu, has_bn) in _LAYERS:
        if kind == "pool":
            continue
        key, sub = jax.random.split(key)
        ks = jax.random.split(sub, 6)
        w = jax.random.normal(ks[0], (k, cin, cout), jnp.float32) / jnp.sqrt(k * cin)
        b = 0.05 * jax.random.normal(ks[1], (cout,), jnp.float32)
        if has_bn:
            gamma = 1.0 + 0.1 * jax.random.normal(ks[2], (cout,), jnp.float32)
            beta = 0.05 * jax.random.normal(ks[3], (cout,), jnp.float32)
            mean = 0.05 * jax.random.normal(ks[4], (cout,), jnp.float32)
            var = jax.random.uniform(ks[5], (cout,), jnp.float32, minval=0.5, maxval=1.5)
            scale = gamma / jnp.sqrt(var + _BN_EPS)
            w = w * scale[None, None, :]     # fold eval-mode BN scale into the weights
            b = (b - mean) * scale + beta    # fold conv bias + running mean + beta
        params.append((w, b.reshape(1, cout)))
    return params


def _pack_params(params):
    """One packed 2-D array per parameterized layer (taps stacked + bias row)."""
    n_param_layers = sum(1 for lyr in _LAYERS if lyr[0] != "pool")
    assert len(params) == n_param_layers
    packed, pi = [], 0
    for (kind, k, sp, _cin, _cout, _relu, _bn) in _LAYERS:
        if kind == "pool":
            continue
        w, b = params[pi]
        pi += 1
        if kind == "deconv" and sp == 2:                      # stride-2: [W0 | W1], [b | b]
            wp = jnp.concatenate([w[0], w[1]], axis=1)
            bp = jnp.concatenate([b, b], axis=1)
        else:
            order = range(k) if kind == "conv" else range(k - 1, -1, -1)   # flip s1-deconv taps
            wp = jnp.concatenate([w[t] for t in order], axis=0)
            bp = b
        packed.append(jnp.concatenate([wp, bp], axis=0))
    # lane-dense output: pad the final conv's output channels with zeros
    last = packed[-1]
    if last.shape[1] < _OUT_LANES:
        packed[-1] = jnp.pad(last, ((0, 0), (0, _OUT_LANES - last.shape[1])))
    return packed


def _block_flops(rows, meta, packed):
    flops, pi, ch = 0, 0, _LAYERS[0][3]
    for entry in meta:
        if entry[0] == "pool":
            flops += 2 * rows * rows * ch
        elif entry[0] == "conv":
            p = packed[pi]; pi += 1
            flops += 2 * rows * (p.shape[0] - 1) * p.shape[1]
            ch = p.shape[1]
        else:
            p = packed[pi]; pi += 1
            flops += 2 * rows * (p.shape[0] - 1) * p.shape[1] + 2 * rows * rows * p.shape[1]
            ch = p.shape[1] // 2
    return flops


# ----------------------------------------------------------------------------
# Wrapper (glue: NCL <-> NLC transpose, batch pad/flatten; everything else in-kernel)
# ----------------------------------------------------------------------------
def tsconvdeconv_forward(params, x_ncl):
    """x_ncl: (N, 76, L) float32 (PyTorch layout). Returns (N, 76, L)."""
    n, c_in, length = x_ncl.shape
    assert c_in == _LAYERS[0][3]
    assert length % 4 == 0 and length >= 16, "supported input lengths: multiples of 4, >= 16"
    stripe = length

    meta, mask_specs, l_final = _build_plan(length, stripe)
    assert l_final == length

    # Batch blocking: B samples per step (B*stripe rows), >= 2 grid steps whenever N >= 2
    # so both v7x TensorCores are used; cap at 8 samples (256 rows) per block.
    bblk = 1 if n <= 1 else max(1, min(8, -(-n // 2)))
    g = -(-n // bblk)
    n_pad = g * bblk
    rows = bblk * stripe

    x_nlc = jnp.transpose(x_ncl, (0, 2, 1)).astype(jnp.float32)        # NCL -> NLC
    if n_pad != n:
        x_nlc = jnp.concatenate(
            [x_nlc, jnp.zeros((n_pad - n, length, c_in), jnp.float32)], axis=0)
    x_flat = x_nlc.reshape(n_pad * length, c_in)

    e_mat, z0_mat, masks = _build_constants(bblk, stripe, mask_specs)
    packed = _pack_params(params)
    cout_final = packed[-1].shape[1]

    def _rep(shape):
        return pl.BlockSpec(shape, lambda i: (0, 0))       # constant index -> DMA'd once

    in_specs = [pl.BlockSpec((rows, c_in), lambda i: (i, 0)),
                _rep(e_mat.shape), _rep(z0_mat.shape), _rep(masks.shape)]
    in_specs += [_rep(p.shape) for p in packed]
    out_spec = pl.BlockSpec((rows, cout_final), lambda i: (i, 0))

    flops = g * _block_flops(rows, meta, packed)
    bytes_acc = 4 * (x_flat.size + e_mat.size + z0_mat.size + masks.size
                     + sum(p.size for p in packed) + n_pad * length * cout_final)

    out_flat = pl.pallas_call(
        functools.partial(_tsconvdeconv_kernel, meta),
        grid=(g,),
        in_specs=in_specs,
        out_specs=out_spec,
        out_shape=jax.ShapeDtypeStruct((n_pad * length, cout_final), jnp.float32),
        compiler_params=pltpu.CompilerParams(dimension_semantics=("parallel",)),
        cost_estimate=pl.CostEstimate(flops=int(flops), transcendentals=0,
                                      bytes_accessed=int(bytes_acc)),
    )(x_flat, e_mat, z0_mat, masks, *packed)

    out = out_flat.reshape(n_pad, length, cout_final)[:n, :, :_LAYERS[-1][4]]
    return jnp.transpose(out, (0, 2, 1))                               # NLC -> NCL


# ----------------------------------------------------------------------------
# Pure-JAX reference (same folded params) for an in-script consistency check
# ----------------------------------------------------------------------------
def _reference_forward(params, x_ncl):
    x = jnp.transpose(x_ncl, (0, 2, 1)).astype(jnp.float32)
    pi = 0
    for (kind, k, sp, cin, cout, relu, has_bn) in _LAYERS:
        if kind == "pool":
            lh = x.shape[1] // 2
            x = jnp.maximum(x[:, 0:2 * lh:2, :], x[:, 1:2 * lh:2, :])
            continue
        w, b = params[pi]
        pi += 1
        if kind == "conv":
            pad = sp
            xp = jnp.pad(x, ((0, 0), (pad, pad), (0, 0))) if pad else x
            lout = x.shape[1] + 2 * pad - k + 1
            y = sum(jnp.einsum("nlc,cd->nld", xp[:, t:t + lout, :], w[t])
                    for t in range(k)) + b
        else:
            stride = sp
            lin = x.shape[1]
            lout = (lin - 1) * stride + k
            y = jnp.zeros((x.shape[0], lout, w.shape[2]), jnp.float32)
            for t in range(k):
                y = y.at[:, t:t + (lin - 1) * stride + 1:stride, :].add(
                    jnp.einsum("nlc,cd->nld", x, w[t]))
            y = y + b
        x = jnp.maximum(y, 0.0) if relu else y
    return jnp.transpose(x, (0, 2, 1))


if __name__ == "__main__":
    key = jax.random.PRNGKey(0)
    pkey, xkey = jax.random.split(key)

    N, C, L = 2, 76, 32       # TSConvEncoder's first conv requires 76 input channels
    params = init_params(pkey)
    x = jax.random.normal(xkey, (N, C, L), jnp.float32)

    fwd = jax.jit(tsconvdeconv_forward)
    out = jax.block_until_ready(fwd(params, x))

    # 32 -> enc: 30,28,(pool)14,12,10,(pool)5 -> dec: 7,14,28,32,32,32 with 76 channels
    assert out.shape == (N, 76, 32), out.shape
    assert out.dtype == jnp.float32

    ref = _reference_forward(params, x)
    assert bool(jnp.allclose(out, ref, rtol=1e-3, atol=1e-3)), \
        float(jnp.max(jnp.abs(out - ref)))

    print("KERNEL_OK")
</pallas_src>

<mosaic_0001>
module attributes {stable_mosaic.version = 11 : i64} {
  func.func @_tsconvdeconv_kernel(%arg0: i32, %arg1: memref<32x76xf32, #tpu.memory_space<vmem>>, %arg2: memref<32x32xf32, #tpu.memory_space<vmem>>, %arg3: memref<32x32xf32, #tpu.memory_space<vmem>>, %arg4: memref<32x4xf32, #tpu.memory_space<vmem>>, %arg5: memref<229x32xf32, #tpu.memory_space<vmem>>, %arg6: memref<97x32xf32, #tpu.memory_space<vmem>>, %arg7: memref<97x64xf32, #tpu.memory_space<vmem>>, %arg8: memref<193x64xf32, #tpu.memory_space<vmem>>, %arg9: memref<193x32xf32, #tpu.memory_space<vmem>>, %arg10: memref<33x64xf32, #tpu.memory_space<vmem>>, %arg11: memref<33x128xf32, #tpu.memory_space<vmem>>, %arg12: memref<321x64xf32, #tpu.memory_space<vmem>>, %arg13: memref<193x64xf32, #tpu.memory_space<vmem>>, %arg14: memref<65x128xf32, #tpu.memory_space<vmem>>, %arg15: memref<32x128xf32, #tpu.memory_space<vmem>>) attributes {dimension_semantics = [#tpu.dimension_semantics<parallel>], iteration_bounds = array<i64: 2>, scalar_prefetch = 0 : i64, scratch_operands = 0 : i64, tpu.core_type = #tpu.core_type<tc>, window_params = [{transform_indices = @transform_0, window_bounds = array<i64: 32, 76>}, {pipeline_mode = #tpu.pipeline_mode<synchronous>, transform_indices = @transform_1, window_bounds = array<i64: 32, 32>}, {pipeline_mode = #tpu.pipeline_mode<synchronous>, transform_indices = @transform_2, window_bounds = array<i64: 32, 32>}, {pipeline_mode = #tpu.pipeline_mode<synchronous>, transform_indices = @transform_3, window_bounds = array<i64: 32, 4>}, {pipeline_mode = #tpu.pipeline_mode<synchronous>, transform_indices = @transform_4, window_bounds = array<i64: 229, 32>}, {pipeline_mode = #tpu.pipeline_mode<synchronous>, transform_indices = @transform_5, window_bounds = array<i64: 97, 32>}, {pipeline_mode = #tpu.pipeline_mode<synchronous>, transform_indices = @transform_6, window_bounds = array<i64: 97, 64>}, {pipeline_mode = #tpu.pipeline_mode<synchronous>, transform_indices = @transform_7, window_bounds = array<i64: 193, 64>}, {pipeline_mode = #tpu.pipeline_mode<synchronous>, transform_indices = @transform_8, window_bounds = array<i64: 193, 32>}, {pipeline_mode = #tpu.pipeline_mode<synchronous>, transform_indices = @transform_9, window_bounds = array<i64: 33, 64>}, {pipeline_mode = #tpu.pipeline_mode<synchronous>, transform_indices = @transform_10, window_bounds = array<i64: 33, 128>}, {pipeline_mode = #tpu.pipeline_mode<synchronous>, transform_indices = @transform_11, window_bounds = array<i64: 321, 64>}, {pipeline_mode = #tpu.pipeline_mode<synchronous>, transform_indices = @transform_12, window_bounds = array<i64: 193, 64>}, {pipeline_mode = #tpu.pipeline_mode<synchronous>, transform_indices = @transform_13, window_bounds = array<i64: 65, 128>}, {transform_indices = @transform_14, window_bounds = array<i64: 32, 128>}]} {
    %c0 = arith.constant 0 : index
    %c0_0 = arith.constant 0 : index
    %0 = vector.load %arg1[%c0, %c0_0] : memref<32x76xf32, #tpu.memory_space<vmem>>, vector<32x76xf32>
    %c0_1 = arith.constant 0 : index
    %c0_2 = arith.constant 0 : index
    %1 = vector.load %arg2[%c0_1, %c0_2] : memref<32x32xf32, #tpu.memory_space<vmem>>, vector<32x32xf32>
    %c0_3 = arith.constant 0 : index
    %c0_4 = arith.constant 0 : index
    %2 = vector.load %arg3[%c0_3, %c0_4] : memref<32x32xf32, #tpu.memory_space<vmem>>, vector<32x32xf32>
    %c0_5 = arith.constant 0 : index
    %c0_6 = arith.constant 0 : index
    %3 = vector.load %arg4[%c0_5, %c0_6] : memref<32x4xf32, #tpu.memory_space<vmem>>, vector<32x4xf32>
    %c0_7 = arith.constant 0 : index
    %c0_8 = arith.constant 0 : index
    %4 = vector.load %arg5[%c0_7, %c0_8] : memref<229x32xf32, #tpu.memory_space<vmem>>, vector<229x32xf32>
    %cst = arith.constant 0.000000e+00 : f32
    %5 = vector.broadcast %cst : f32 to vector<1x76xf32>
    %6 = vector.extract_strided_slice %0 {offsets = [1, 0], sizes = [31, 76], strides = [1, 1]} : vector<32x76xf32> to vector<31x76xf32>
    %7 = tpu.concatenate %6, %5 in 0 : vector<31x76xf32>, vector<1x76xf32> -> vector<32x76xf32>
    %cst_9 = arith.constant 0.000000e+00 : f32
    %8 = vector.broadcast %cst_9 : f32 to vector<2x76xf32>
    %9 = vector.extract_strided_slice %0 {offsets = [2, 0], sizes = [30, 76], strides = [1, 1]} : vector<32x76xf32> to vector<30x76xf32>
    %10 = tpu.concatenate %9, %8 in 0 : vector<30x76xf32>, vector<2x76xf32> -> vector<32x76xf32>
    %11 = tpu.concatenate %0, %7, %10 in 1 : vector<32x76xf32>, vector<32x76xf32>, vector<32x76xf32> -> vector<32x228xf32>
    %12 = vector.extract_strided_slice %4 {offsets = [0, 0], sizes = [228, 32], strides = [1, 1]} : vector<229x32xf32> to vector<228x32xf32>
    %cst_10 = arith.constant dense<0.000000e+00> : vector<32x32xf32>
    %13 = tpu.matmul %11, %12, %cst_10 {dimension_numbers = #tpu.dot_dimension_numbers<[1], [0], [0], [1], [0, 0, 1, 1], [], []>} : vector<32x228xf32>, vector<228x32xf32>, vector<32x32xf32> -> vector<32x32xf32>
    %14 = vector.extract_strided_slice %4 {offsets = [228, 0], sizes = [1, 32], strides = [1, 1]} : vector<229x32xf32> to vector<1x32xf32>
    %15 = vector.broadcast %14 : vector<1x32xf32> to vector<32x32xf32>
    %16 = arith.addf %13, %15 : vector<32x32xf32>
    %cst_11 = arith.constant 0.000000e+00 : f32
    %17 = vector.broadcast %cst_11 : f32 to vector<32x32xf32>
    %18 = arith.maximumf %16, %17 : vector<32x32xf32>
    %c0_12 = arith.constant 0 : index
    %c0_13 = arith.constant 0 : index
    %19 = vector.load %arg6[%c0_12, %c0_13] : memref<97x32xf32, #tpu.memory_space<vmem>>, vector<97x32xf32>
    %cst_14 = arith.constant 0.000000e+00 : f32
    %20 = vector.broadcast %cst_14 : f32 to vector<1x32xf32>
    %21 = vector.extract_strided_slice %18 {offsets = [1, 0], sizes = [31, 32], strides = [1, 1]} : vector<32x32xf32> to vector<31x32xf32>
    %22 = tpu.concatenate %21, %20 in 0 : vector<31x32xf32>, vector<1x32xf32> -> vector<32x32xf32>
    %cst_15 = arith.constant 0.000000e+00 : f32
    %23 = vector.broadcast %cst_15 : f32 to vector<2x32xf32>
    %24 = vector.extract_strided_slice %18 {offsets = [2, 0], sizes = [30, 32], strides = [1, 1]} : vector<32x32xf32> to vector<30x32xf32>
    %25 = tpu.concatenate %24, %23 in 0 : vector<30x32xf32>, vector<2x32xf32> -> vector<32x32xf32>
    %26 = tpu.concatenate %18, %22, %25 in 1 : vector<32x32xf32>, vector<32x32xf32>, vector<32x32xf32> -> vector<32x96xf32>
    %27 = vector.extract_strided_slice %19 {offsets = [0, 0], sizes = [96, 32], strides = [1, 1]} : vector<97x32xf32> to vector<96x32xf32>
    %cst_16 = arith.constant dense<0.000000e+00> : vector<32x32xf32>
    %28 = tpu.matmul %26, %27, %cst_16 {dimension_numbers = #tpu.dot_dimension_numbers<[1], [0], [0], [1], [0, 0, 1, 1], [], []>} : vector<32x96xf32>, vector<96x32xf32>, vector<32x32xf32> -> vector<32x32xf32>
    %29 = vector.extract_strided_slice %19 {offsets = [96, 0], sizes = [1, 32], strides = [1, 1]} : vector<97x32xf32> to vector<1x32xf32>
    %30 = vector.broadcast %29 : vector<1x32xf32> to vector<32x32xf32>
    %31 = arith.addf %28, %30 : vector<32x32xf32>
    %cst_17 = arith.constant 0.000000e+00 : f32
    %32 = vector.broadcast %cst_17 : f32 to vector<32x32xf32>
    %33 = arith.maximumf %31, %32 : vector<32x32xf32>
    %cst_18 = arith.constant 0.000000e+00 : f32
    %34 = vector.broadcast %cst_18 : f32 to vector<1x32xf32>
    %35 = vector.extract_strided_slice %33 {offsets = [1, 0], sizes = [31, 32], strides = [1, 1]} : vector<32x32xf32> to vector<31x32xf32>
    %36 = tpu.concatenate %35, %34 in 0 : vector<31x32xf32>, vector<1x32xf32> -> vector<32x32xf32>
    %37 = arith.maximumf %33, %36 : vector<32x32xf32>
    %cst_19 = arith.constant dense<0.000000e+00> : vector<32x32xf32>
    %38 = tpu.matmul %1, %37, %cst_19 {dimension_numbers = #tpu.dot_dimension_numbers<[1], [0], [0], [1], [0, 0, 1, 1], [], []>} : vector<32x32xf32>, vector<32x32xf32>, vector<32x32xf32> -> vector<32x32xf32>
    %c0_20 = arith.constant 0 : index
    %c0_21 = arith.constant 0 : index
    %39 = vector.load %arg7[%c0_20, %c0_21] : memref<97x64xf32, #tpu.memory_space<vmem>>, vector<97x64xf32>
    %cst_22 = arith.constant 0.000000e+00 : f32
    %40 = vector.broadcast %cst_22 : f32 to vector<1x32xf32>
    %41 = vector.extract_strided_slice %38 {offsets = [1, 0], sizes = [31, 32], strides = [1, 1]} : vector<32x32xf32> to vector<31x32xf32>
    %42 = tpu.concatenate %41, %40 in 0 : vector<31x32xf32>, vector<1x32xf32> -> vector<32x32xf32>
    %cst_23 = arith.constant 0.000000e+00 : f32
    %43 = vector.broadcast %cst_23 : f32 to vector<2x32xf32>
    %44 = vector.extract_strided_slice %38 {offsets = [2, 0], sizes = [30, 32], strides = [1, 1]} : vector<32x32xf32> to vector<30x32xf32>
    %45 = tpu.concatenate %44, %43 in 0 : vector<30x32xf32>, vector<2x32xf32> -> vector<32x32xf32>
    %46 = tpu.concatenate %38, %42, %45 in 1 : vector<32x32xf32>, vector<32x32xf32>, vector<32x32xf32> -> vector<32x96xf32>
    %47 = vector.extract_strided_slice %39 {offsets = [0, 0], sizes = [96, 64], strides = [1, 1]} : vector<97x64xf32> to vector<96x64xf32>
    %cst_24 = arith.constant dense<0.000000e+00> : vector<32x64xf32>
    %48 = tpu.matmul %46, %47, %cst_24 {dimension_numbers = #tpu.dot_dimension_numbers<[1], [0], [0], [1], [0, 0, 1, 1], [], []>} : vector<32x96xf32>, vector<96x64xf32>, vector<32x64xf32> -> vector<32x64xf32>
    %49 = vector.extract_strided_slice %39 {offsets = [96, 0], sizes = [1, 64], strides = [1, 1]} : vector<97x64xf32> to vector<1x64xf32>
    %50 = vector.broadcast %49 : vector<1x64xf32> to vector<32x64xf32>
    %51 = arith.addf %48, %50 : vector<32x64xf32>
    %cst_25 = arith.constant 0.000000e+00 : f32
    %52 = vector.broadcast %cst_25 : f32 to vector<32x64xf32>
    %53 = arith.maximumf %51, %52 : vector<32x64xf32>
    %c0_26 = arith.constant 0 : index
    %c0_27 = arith.constant 0 : index
    %54 = vector.load %arg8[%c0_26, %c0_27] : memref<193x64xf32, #tpu.memory_space<vmem>>, vector<193x64xf32>
    %cst_28 = arith.constant 0.000000e+00 : f32
    %55 = vector.broadcast %cst_28 : f32 to vector<1x64xf32>
    %56 = vector.extract_strided_slice %53 {offsets = [1, 0], sizes = [31, 64], strides = [1, 1]} : vector<32x64xf32> to vector<31x64xf32>
    %57 = tpu.concatenate %56, %55 in 0 : vector<31x64xf32>, vector<1x64xf32> -> vector<32x64xf32>
    %cst_29 = arith.constant 0.000000e+00 : f32
    %58 = vector.broadcast %cst_29 : f32 to vector<2x64xf32>
    %59 = vector.extract_strided_slice %53 {offsets = [2, 0], sizes = [30, 64], strides = [1, 1]} : vector<32x64xf32> to vector<30x64xf32>
    %60 = tpu.concatenate %59, %58 in 0 : vector<30x64xf32>, vector<2x64xf32> -> vector<32x64xf32>
    %61 = tpu.concatenate %53, %57, %60 in 1 : vector<32x64xf32>, vector<32x64xf32>, vector<32x64xf32> -> vector<32x192xf32>
    %62 = vector.extract_strided_slice %54 {offsets = [0, 0], sizes = [192, 64], strides = [1, 1]} : vector<193x64xf32> to vector<192x64xf32>
    %cst_30 = arith.constant dense<0.000000e+00> : vector<32x64xf32>
    %63 = tpu.matmul %61, %62, %cst_30 {dimension_numbers = #tpu.dot_dimension_numbers<[1], [0], [0], [1], [0, 0, 1, 1], [], []>} : vector<32x192xf32>, vector<192x64xf32>, vector<32x64xf32> -> vector<32x64xf32>
    %64 = vector.extract_strided_slice %54 {offsets = [192, 0], sizes = [1, 64], strides = [1, 1]} : vector<193x64xf32> to vector<1x64xf32>
    %65 = vector.broadcast %64 : vector<1x64xf32> to vector<32x64xf32>
    %66 = arith.addf %63, %65 : vector<32x64xf32>
    %cst_31 = arith.constant 0.000000e+00 : f32
    %67 = vector.broadcast %cst_31 : f32 to vector<32x64xf32>
    %68 = arith.maximumf %66, %67 : vector<32x64xf32>
    %cst_32 = arith.constant 0.000000e+00 : f32
    %69 = vector.broadcast %cst_32 : f32 to vector<1x64xf32>
    %70 = vector.extract_strided_slice %68 {offsets = [1, 0], sizes = [31, 64], strides = [1, 1]} : vector<32x64xf32> to vector<31x64xf32>
    %71 = tpu.concatenate %70, %69 in 0 : vector<31x64xf32>, vector<1x64xf32> -> vector<32x64xf32>
    %72 = arith.maximumf %68, %71 : vector<32x64xf32>
    %cst_33 = arith.constant dense<0.000000e+00> : vector<32x64xf32>
    %73 = tpu.matmul %1, %72, %cst_33 {dimension_numbers = #tpu.dot_dimension_numbers<[1], [0], [0], [1], [0, 0, 1, 1], [], []>} : vector<32x32xf32>, vector<32x64xf32>, vector<32x64xf32> -> vector<32x64xf32>
    %74 = vector.extract_strided_slice %3 {offsets = [0, 0], sizes = [32, 1], strides = [1, 1]} : vector<32x4xf32> to vector<32x1xf32>
    %c0_34 = arith.constant 0 : index
    %c0_35 = arith.constant 0 : index
    %75 = vector.load %arg9[%c0_34, %c0_35] : memref<193x32xf32, #tpu.memory_space<vmem>>, vector<193x32xf32>
    %76 = vector.broadcast %74 : vector<32x1xf32> to vector<32x64xf32>
    %77 = arith.mulf %73, %76 : vector<32x64xf32>
    %cst_36 = arith.constant 0.000000e+00 : f32
    %78 = vector.broadcast %cst_36 : f32 to vector<2x64xf32>
    %79 = vector.extract_strided_slice %77 {offsets = [0, 0], sizes = [30, 64], strides = [1, 1]} : vector<32x64xf32> to vector<30x64xf32>
    %80 = tpu.concatenate %78, %79 in 0 : vector<2x64xf32>, vector<30x64xf32> -> vector<32x64xf32>
    %cst_37 = arith.constant 0.000000e+00 : f32
    %81 = vector.broadcast %cst_37 : f32 to vector<1x64xf32>
    %82 = vector.extract_strided_slice %77 {offsets = [0, 0], sizes = [31, 64], strides = [1, 1]} : vector<32x64xf32> to vector<31x64xf32>
    %83 = tpu.concatenate %81, %82 in 0 : vector<1x64xf32>, vector<31x64xf32> -> vector<32x64xf32>
    %84 = tpu.concatenate %80, %83, %77 in 1 : vector<32x64xf32>, vector<32x64xf32>, vector<32x64xf32> -> vector<32x192xf32>
    %85 = vector.extract_strided_slice %75 {offsets = [0, 0], sizes = [192, 32], strides = [1, 1]} : vector<193x32xf32> to vector<192x32xf32>
    %cst_38 = arith.constant dense<0.000000e+00> : vector<32x32xf32>
    %86 = tpu.matmul %84, %85, %cst_38 {dimension_numbers = #tpu.dot_dimension_numbers<[1], [0], [0], [1], [0, 0, 1, 1], [], []>} : vector<32x192xf32>, vector<192x32xf32>, vector<32x32xf32> -> vector<32x32xf32>
    %87 = vector.extract_strided_slice %75 {offsets = [192, 0], sizes = [1, 32], strides = [1, 1]} : vector<193x32xf32> to vector<1x32xf32>
    %88 = vector.broadcast %87 : vector<1x32xf32> to vector<32x32xf32>
    %89 = arith.addf %86, %88 : vector<32x32xf32>
    %cst_39 = arith.constant 0.000000e+00 : f32
    %90 = vector.broadcast %cst_39 : f32 to vector<32x32xf32>
    %91 = arith.maximumf %89, %90 : vector<32x32xf32>
    %c0_40 = arith.constant 0 : index
    %c0_41 = arith.constant 0 : index
    %92 = vector.load %arg10[%c0_40, %c0_41] : memref<33x64xf32, #tpu.memory_space<vmem>>, vector<33x64xf32>
    %93 = vector.extract_strided_slice %92 {offsets = [0, 0], sizes = [32, 64], strides = [1, 1]} : vector<33x64xf32> to vector<32x64xf32>
    %cst_42 = arith.constant dense<0.000000e+00> : vector<32x64xf32>
    %94 = tpu.matmul %91, %93, %cst_42 {dimension_numbers = #tpu.dot_dimension_numbers<[1], [0], [0], [1], [0, 0, 1, 1], [], []>} : vector<32x32xf32>, vector<32x64xf32>, vector<32x64xf32> -> vector<32x64xf32>
    %cst_43 = arith.constant dense<0.000000e+00> : vector<32x64xf32>
    %95 = tpu.matmul %2, %94, %cst_43 {dimension_numbers = #tpu.dot_dimension_numbers<[1], [0], [0], [1], [0, 0, 1, 1], [], []>} : vector<32x32xf32>, vector<32x64xf32>, vector<32x64xf32> -> vector<32x64xf32>
    %96 = vector.extract_strided_slice %95 {offsets = [0, 0], sizes = [32, 32], strides = [1, 1]} : vector<32x64xf32> to vector<32x32xf32>
    %97 = vector.extract_strided_slice %95 {offsets = [0, 32], sizes = [32, 32], strides = [1, 1]} : vector<32x64xf32> to vector<32x32xf32>
    %cst_44 = arith.constant 0.000000e+00 : f32
    %98 = vector.broadcast %cst_44 : f32 to vector<1x32xf32>
    %99 = vector.extract_strided_slice %97 {offsets = [0, 0], sizes = [31, 32], strides = [1, 1]} : vector<32x32xf32> to vector<31x32xf32>
    %100 = tpu.concatenate %98, %99 in 0 : vector<1x32xf32>, vector<31x32xf32> -> vector<32x32xf32>
    %101 = arith.addf %96, %100 : vector<32x32xf32>
    %102 = vector.extract_strided_slice %92 {offsets = [32, 0], sizes = [1, 32], strides = [1, 1]} : vector<33x64xf32> to vector<1x32xf32>
    %103 = vector.broadcast %102 : vector<1x32xf32> to vector<32x32xf32>
    %104 = arith.addf %101, %103 : vector<32x32xf32>
    %cst_45 = arith.constant 0.000000e+00 : f32
    %105 = vector.broadcast %cst_45 : f32 to vector<32x32xf32>
    %106 = arith.maximumf %104, %105 : vector<32x32xf32>
    %c0_46 = arith.constant 0 : index
    %c0_47 = arith.constant 0 : index
    %107 = vector.load %arg11[%c0_46, %c0_47] : memref<33x128xf32, #tpu.memory_space<vmem>>, vector<33x128xf32>
    %108 = vector.extract_strided_slice %107 {offsets = [0, 0], sizes = [32, 128], strides = [1, 1]} : vector<33x128xf32> to vector<32x128xf32>
    %cst_48 = arith.constant dense<0.000000e+00> : vector<32x128xf32>
    %109 = tpu.matmul %106, %108, %cst_48 {dimension_numbers = #tpu.dot_dimension_numbers<[1], [0], [0], [1], [0, 0, 1, 1], [], []>} : vector<32x32xf32>, vector<32x128xf32>, vector<32x128xf32> -> vector<32x128xf32>
    %cst_49 = arith.constant dense<0.000000e+00> : vector<32x128xf32>
    %110 = tpu.matmul %2, %109, %cst_49 {dimension_numbers = #tpu.dot_dimension_numbers<[1], [0], [0], [1], [0, 0, 1, 1], [], []>} : vector<32x32xf32>, vector<32x128xf32>, vector<32x128xf32> -> vector<32x128xf32>
    %111 = vector.extract_strided_slice %110 {offsets = [0, 0], sizes = [32, 64], strides = [1, 1]} : vector<32x128xf32> to vector<32x64xf32>
    %112 = vector.extract_strided_slice %110 {offsets = [0, 64], sizes = [32, 64], strides = [1, 1]} : vector<32x128xf32> to vector<32x64xf32>
    %cst_50 = arith.constant 0.000000e+00 : f32
    %113 = vector.broadcast %cst_50 : f32 to vector<1x64xf32>
    %114 = vector.extract_strided_slice %112 {offsets = [0, 0], sizes = [31, 64], strides = [1, 1]} : vector<32x64xf32> to vector<31x64xf32>
    %115 = tpu.concatenate %113, %114 in 0 : vector<1x64xf32>, vector<31x64xf32> -> vector<32x64xf32>
    %116 = arith.addf %111, %115 : vector<32x64xf32>
    %117 = vector.extract_strided_slice %107 {offsets = [32, 0], sizes = [1, 64], strides = [1, 1]} : vector<33x128xf32> to vector<1x64xf32>
    %118 = vector.broadcast %117 : vector<1x64xf32> to vector<32x64xf32>
    %119 = arith.addf %116, %118 : vector<32x64xf32>
    %cst_51 = arith.constant 0.000000e+00 : f32
    %120 = vector.broadcast %cst_51 : f32 to vector<32x64xf32>
    %121 = arith.maximumf %119, %120 : vector<32x64xf32>
    %122 = vector.extract_strided_slice %3 {offsets = [0, 1], sizes = [32, 1], strides = [1, 1]} : vector<32x4xf32> to vector<32x1xf32>
    %c0_52 = arith.constant 0 : index
    %c0_53 = arith.constant 0 : index
    %123 = vector.load %arg12[%c0_52, %c0_53] : memref<321x64xf32, #tpu.memory_space<vmem>>, vector<321x64xf32>
    %124 = vector.broadcast %122 : vector<32x1xf32> to vector<32x64xf32>
    %125 = arith.mulf %121, %124 : vector<32x64xf32>
    %cst_54 = arith.constant 0.000000e+00 : f32
    %126 = vector.broadcast %cst_54 : f32 to vector<4x64xf32>
    %127 = vector.extract_strided_slice %125 {offsets = [0, 0], sizes = [28, 64], strides = [1, 1]} : vector<32x64xf32> to vector<28x64xf32>
    %128 = tpu.concatenate %126, %127 in 0 : vector<4x64xf32>, vector<28x64xf32> -> vector<32x64xf32>
    %cst_55 = arith.constant 0.000000e+00 : f32
    %129 = vector.broadcast %cst_55 : f32 to vector<3x64xf32>
    %130 = vector.extract_strided_slice %125 {offsets = [0, 0], sizes = [29, 64], strides = [1, 1]} : vector<32x64xf32> to vector<29x64xf32>
    %131 = tpu.concatenate %129, %130 in 0 : vector<3x64xf32>, vector<29x64xf32> -> vector<32x64xf32>
    %cst_56 = arith.constant 0.000000e+00 : f32
    %132 = vector.broadcast %cst_56 : f32 to vector<2x64xf32>
    %133 = vector.extract_strided_slice %125 {offsets = [0, 0], sizes = [30, 64], strides = [1, 1]} : vector<32x64xf32> to vector<30x64xf32>
    %134 = tpu.concatenate %132, %133 in 0 : vector<2x64xf32>, vector<30x64xf32> -> vector<32x64xf32>
    %cst_57 = arith.constant 0.000000e+00 : f32
    %135 = vector.broadcast %cst_57 : f32 to vector<1x64xf32>
    %136 = vector.extract_strided_slice %125 {offsets = [0, 0], sizes = [31, 64], strides = [1, 1]} : vector<32x64xf32> to vector<31x64xf32>
    %137 = tpu.concatenate %135, %136 in 0 : vector<1x64xf32>, vector<31x64xf32> -> vector<32x64xf32>
    %138 = tpu.concatenate %128, %131, %134, %137, %125 in 1 : vector<32x64xf32>, vector<32x64xf32>, vector<32x64xf32>, vector<32x64xf32>, vector<32x64xf32> -> vector<32x320xf32>
    %139 = vector.extract_strided_slice %123 {offsets = [0, 0], sizes = [320, 64], strides = [1, 1]} : vector<321x64xf32> to vector<320x64xf32>
    %cst_58 = arith.constant dense<0.000000e+00> : vector<32x64xf32>
    %140 = tpu.matmul %138, %139, %cst_58 {dimension_numbers = #tpu.dot_dimension_numbers<[1], [0], [0], [1], [0, 0, 1, 1], [], []>} : vector<32x320xf32>, vector<320x64xf32>, vector<32x64xf32> -> vector<32x64xf32>
    %141 = vector.extract_strided_slice %123 {offsets = [320, 0], sizes = [1, 64], strides = [1, 1]} : vector<321x64xf32> to vector<1x64xf32>
    %142 = vector.broadcast %141 : vector<1x64xf32> to vector<32x64xf32>
    %143 = arith.addf %140, %142 : vector<32x64xf32>
    %cst_59 = arith.constant 0.000000e+00 : f32
    %144 = vector.broadcast %cst_59 : f32 to vector<32x64xf32>
    %145 = arith.maximumf %143, %144 : vector<32x64xf32>
    %146 = vector.extract_strided_slice %3 {offsets = [0, 2], sizes = [32, 1], strides = [1, 1]} : vector<32x4xf32> to vector<32x1xf32>
    %147 = vector.extract_strided_slice %3 {offsets = [0, 3], sizes = [32, 1], strides = [1, 1]} : vector<32x4xf32> to vector<32x1xf32>
    %c0_60 = arith.constant 0 : index
    %c0_61 = arith.constant 0 : index
    %148 = vector.load %arg13[%c0_60, %c0_61] : memref<193x64xf32, #tpu.memory_space<vmem>>, vector<193x64xf32>
    %cst_62 = arith.constant 0.000000e+00 : f32
    %149 = vector.broadcast %cst_62 : f32 to vector<1x64xf32>
    %150 = vector.extract_strided_slice %145 {offsets = [0, 0], sizes = [31, 64], strides = [1, 1]} : vector<32x64xf32> to vector<31x64xf32>
    %151 = tpu.concatenate %149, %150 in 0 : vector<1x64xf32>, vector<31x64xf32> -> vector<32x64xf32>
    %152 = vector.broadcast %146 : vector<32x1xf32> to vector<32x64xf32>
    %153 = arith.mulf %151, %152 : vector<32x64xf32>
    %cst_63 = arith.constant 0.000000e+00 : f32
    %154 = vector.broadcast %cst_63 : f32 to vector<1x64xf32>
    %155 = vector.extract_strided_slice %145 {offsets = [1, 0], sizes = [31, 64], strides = [1, 1]} : vector<32x64xf32> to vector<31x64xf32>
    %156 = tpu.concatenate %155, %154 in 0 : vector<31x64xf32>, vector<1x64xf32> -> vector<32x64xf32>
    %157 = vector.broadcast %147 : vector<32x1xf32> to vector<32x64xf32>
    %158 = arith.mulf %156, %157 : vector<32x64xf32>
    %159 = tpu.concatenate %153, %145, %158 in 1 : vector<32x64xf32>, vector<32x64xf32>, vector<32x64xf32> -> vector<32x192xf32>
    %160 = vector.extract_strided_slice %148 {offsets = [0, 0], sizes = [192, 64], strides = [1, 1]} : vector<193x64xf32> to vector<192x64xf32>
    %cst_64 = arith.constant dense<0.000000e+00> : vector<32x64xf32>
    %161 = tpu.matmul %159, %160, %cst_64 {dimension_numbers = #tpu.dot_dimension_numbers<[1], [0], [0], [1], [0, 0, 1, 1], [], []>} : vector<32x192xf32>, vector<192x64xf32>, vector<32x64xf32> -> vector<32x64xf32>
    %162 = vector.extract_strided_slice %148 {offsets = [192, 0], sizes = [1, 64], strides = [1, 1]} : vector<193x64xf32> to vector<1x64xf32>
    %163 = vector.broadcast %162 : vector<1x64xf32> to vector<32x64xf32>
    %164 = arith.addf %161, %163 : vector<32x64xf32>
    %c0_65 = arith.constant 0 : index
    %c0_66 = arith.constant 0 : index
    %165 = vector.load %arg14[%c0_65, %c0_66] : memref<65x128xf32, #tpu.memory_space<vmem>>, vector<65x128xf32>
    %166 = vector.extract_strided_slice %165 {offsets = [0, 0], sizes = [64, 128], strides = [1, 1]} : vector<65x128xf32> to vector<64x128xf32>
    %cst_67 = arith.constant dense<0.000000e+00> : vector<32x128xf32>
    %167 = tpu.matmul %164, %166, %cst_67 {dimension_numbers = #tpu.dot_dimension_numbers<[1], [0], [0], [1], [0, 0, 1, 1], [], []>} : vector<32x64xf32>, vector<64x128xf32>, vector<32x128xf32> -> vector<32x128xf32>
    %168 = vector.extract_strided_slice %165 {offsets = [64, 0], sizes = [1, 128], strides = [1, 1]} : vector<65x128xf32> to vector<1x128xf32>
    %169 = vector.broadcast %168 : vector<1x128xf32> to vector<32x128xf32>
    %170 = arith.addf %167, %169 : vector<32x128xf32>
    %c0_68 = arith.constant 0 : index
    %c0_69 = arith.constant 0 : index
    %171 = vector.load %arg15[%c0_68, %c0_69] : memref<32x128xf32, #tpu.memory_space<vmem>>, vector<32x128xf32>
    tpu.vector_store %arg15[%c0_68, %c0_69], %170 {strides = array<i32>} : memref<32x128xf32, #tpu.memory_space<vmem>>, vector<32x128xf32>,
    return
  }
  func.func @transform_0(%arg0: i32) -> (i32, i32) {
    %c0_i32 = arith.constant 0 : i32
    %c0_i32_0 = arith.constant 0 : i32
    return %arg0, %c0_i32 : i32, i32
  }
  func.func @transform_1(%arg0: i32) -> (i32, i32) {
    %c0_i32 = arith.constant 0 : i32
    %c0_i32_0 = arith.constant 0 : i32
    %c0_i32_1 = arith.constant 0 : i32
    return %c0_i32, %c0_i32_0 : i32, i32
  }
  func.func @transform_2(%arg0: i32) -> (i32, i32) {
    %c0_i32 = arith.constant 0 : i32
    %c0_i32_0 = arith.constant 0 : i32
    %c0_i32_1 = arith.constant 0 : i32
    return %c0_i32, %c0_i32_0 : i32, i32
  }
  func.func @transform_3(%arg0: i32) -> (i32, i32) {
    %c0_i32 = arith.constant 0 : i32
    %c0_i32_0 = arith.constant 0 : i32
    %c0_i32_1 = arith.constant 0 : i32
    return %c0_i32, %c0_i32_0 : i32, i32
  }
  func.func @transform_4(%arg0: i32) -> (i32, i32) {
    %c0_i32 = arith.constant 0 : i32
    %c0_i32_0 = arith.constant 0 : i32
    %c0_i32_1 = arith.constant 0 : i32
    return %c0_i32, %c0_i32_0 : i32, i32
  }
  func.func @transform_5(%arg0: i32) -> (i32, i32) {
    %c0_i32 = arith.constant 0 : i32
    %c0_i32_0 = arith.constant 0 : i32
    %c0_i32_1 = arith.constant 0 : i32
    return %c0_i32, %c0_i32_0 : i32, i32
  }
  func.func @transform_6(%arg0: i32) -> (i32, i32) {
    %c0_i32 = arith.constant 0 : i32
    %c0_i32_0 = arith.constant 0 : i32
    %c0_i32_1 = arith.constant 0 : i32
    return %c0_i32, %c0_i32_0 : i32, i32
  }
  func.func @transform_7(%arg0: i32) -> (i32, i32) {
    %c0_i32 = arith.constant 0 : i32
    %c0_i32_0 = arith.constant 0 : i32
    %c0_i32_1 = arith.constant 0 : i32
    return %c0_i32, %c0_i32_0 : i32, i32
  }
  func.func @transform_8(%arg0: i32) -> (i32, i32) {
    %c0_i32 = arith.constant 0 : i32
    %c0_i32_0 = arith.constant 0 : i32
    %c0_i32_1 = arith.constant 0 : i32
    return %c0_i32, %c0_i32_0 : i32, i32
  }
  func.func @transform_9(%arg0: i32) -> (i32, i32) {
    %c0_i32 = arith.constant 0 : i32
    %c0_i32_0 = arith.constant 0 : i32
    %c0_i32_1 = arith.constant 0 : i32
    return %c0_i32, %c0_i32_0 : i32, i32
  }
  func.func @transform_10(%arg0: i32) -> (i32, i32) {
    %c0_i32 = arith.constant 0 : i32
    %c0_i32_0 = arith.constant 0 : i32
    %c0_i32_1 = arith.constant 0 : i32
    return %c0_i32, %c0_i32_0 : i32, i32
  }
  func.func @transform_11(%arg0: i32) -> (i32, i32) {
    %c0_i32 = arith.constant 0 : i32
    %c0_i32_0 = arith.constant 0 : i32
    %c0_i32_1 = arith.constant 0 : i32
    return %c0_i32, %c0_i32_0 : i32, i32
  }
  func.func @transform_12(%arg0: i32) -> (i32, i32) {
    %c0_i32 = arith.constant 0 : i32
    %c0_i32_0 = arith.constant 0 : i32
    %c0_i32_1 = arith.constant 0 : i32
    return %c0_i32, %c0_i32_0 : i32, i32
  }
  func.func @transform_13(%arg0: i32) -> (i32, i32) {
    %c0_i32 = arith.constant 0 : i32
    %c0_i32_0 = arith.constant 0 : i32
    %c0_i32_1 = arith.constant 0 : i32
    return %c0_i32, %c0_i32_0 : i32, i32
  }
  func.func @transform_14(%arg0: i32) -> (i32, i32) {
    %c0_i32 = arith.constant 0 : i32
    %c0_i32_0 = arith.constant 0 : i32
    return %arg0, %c0_i32 : i32, i32
  }
}

</mosaic_0001>

<bundles_post_ra>
// kernel: tsconvdeconv_forward.1
= control target key start
LH: loop header
LB: loop body
LE: loop exit
PB: predicated region body
PF: predicated region fallthrough
CT: control target
= control target key end

     0   :  { %s3660_s29 = smov 0   ;;  %s4670_s0 = inlined_call_operand.vmem [shape: f32[64,76], index: 0, kind: input, shape index: {}]   ;;  %s4671_s1 = inlined_call_operand.vmem [shape: f32[32,32], index: 1, kind: input, shape index: {}]   ;;  %s4672_s2 = inlined_call_operand.vmem [shape: f32[32,32], index: 2, kind: input, shape index: {}]   ;;  %s4673_s3 = inlined_call_operand.vmem [shape: f32[32,4], index: 3, kind: input, shape index: {}]   ;;  %s4674_s4 = inlined_call_operand.vmem [shape: f32[229,32], index: 4, kind: input, shape index: {}]   ;;  %s4675_s5 = inlined_call_operand.vmem [shape: f32[97,32], index: 5, kind: input, shape index: {}]   ;;  %s4676_s6 = inlined_call_operand.vmem [shape: f32[97,64], index: 6, kind: input, shape index: {}]   ;;  %s4677_s7 = inlined_call_operand.vmem [shape: f32[193,64], index: 7, kind: input, shape index: {}]   ;;  %s4678_s8 = inlined_call_operand.vmem [shape: f32[193,32], index: 8, kind: input, shape index: {}]   ;;  %s4679_s9 = inlined_call_operand.vmem [shape: f32[33,64], index: 9, kind: input, shape index: {}]   ;;  %s4680_s10 = inlined_call_operand.vmem [shape: f32[33,128], index: 10, kind: input, shape index: {}]   ;;  %s4681_s11 = inlined_call_operand.vmem [shape: f32[321,64], index: 11, kind: input, shape index: {}]   ;;  %s4682_s12 = inlined_call_operand.vmem [shape: f32[193,64], index: 12, kind: input, shape index: {}]   ;;  %s4683_s13 = inlined_call_operand.vmem [shape: f32[65,128], index: 13, kind: input, shape index: {}]   ;;  %s4684_s14 = inlined_call_operand.vmem [shape: f32[64,128], index: 14, kind: output, shape index: {}]  }
   0x1 LB: > { %s2793_s30 = sadd.s32 4294967295, %s3572_s29   ;;  %p2797_p0 = scmp.ge.s32.totalorder %s3572_s29, 1  ;;  %s3572_s29 = sphi %s3660_s29, %s24_s29  }
   0x2   : > { %p413_p1 = scmp.lt.s32.totalorder %s3572_s29, 3 }
   0x4   : > { %p414_p2 = pnand %p2797_p0, %p413_p1 }
   0x5   : > { %s2798_s15 = sshll.u32 (!%p414_p2), %s2793_s30, 2  ;;  %v487_v0 = vld [vmem:[%s4674_s4] sm:$0xff] (!%p414_p2)  ;;  %v3574_v1 = vmov (!%p414_p2), 0.0|0.0   ;;  %v488_v2 = vld [vmem:[%s4674_s4 + $0x8] sm:$0xff] (!%p414_p2)  ;;  %v489_v3 = vld [vmem:[%s4674_s4 + $0x10] sm:$0xff] (!%p414_p2)  ;;  %vm520_vm0 = vcmask (!%p414_p2), 1046528  }
   0x6   : > { %417 = sbr.rel (%p414_p2) target bundleno = 4246 (0x1096), region = 76  ;;  %p460_p3 = scmp.lt.s32.totalorder (!%p414_p2), %s2798_s15, 7  ;;  %3206 = vmatprep.subr.bf16.mxu0 (!%p414_p2), %v3574_v1  ;;  %v490_v4 = vld [vmem:[%s4674_s4 + $0x18] sm:$0xff] (!%p414_p2)  ;;  %v3207_v5 = vpack.c.bf16 (!%p414_p2), %v488_v2, %v487_v0  ;;  %v491_v7 = vld [vmem:[%s4674_s4 + $0x20] sm:$0xff] (!%p414_p2)  ;;  %v492_v8 = vld [vmem:[%s4674_s4 + $0x28] sm:$0xff] (!%p414_p2)  ;;  %vm530_vm1 = vcmask (!%p414_p2), 1045504  }
   0x7   : > { %v3210_v6 = vpack.c.bf16 (!%p414_p2), %v490_v4, %v489_v3  ;;  %v3213_v12 = vpack.c.bf16 (!%p414_p2), %v492_v8, %v491_v7  ;;  %v493_v17 = vld [vmem:[%s4674_s4 + $0x30] sm:$0xff] (!%p414_p2)  ;;  %v494_v18 = vld [vmem:[%s4674_s4 + $0x38] sm:$0xff] (!%p414_p2)  ;;  %s3575_s22 = smov (!%p414_p2), 76   ;;  %v495_v29 = vld [vmem:[%s4674_s4 + $0x40] sm:$0xff] (!%p414_p2)  ;;  %s3576_s27 = smov (!%p414_p2), 24   ;;  %v3577_v63 = vmov (!%p414_p2), 0.0  }
   0x8   : > { %3208 = vmatpush1.bf16.msra.mxu0 (!%p414_p2), %v3207_v5  ;;  %v3216_v24 = vpack.c.bf16 (!%p414_p2), %v494_v18, %v493_v17  ;;  %v496_v30 = vld [vmem:[%s4674_s4 + $0x48] sm:$0xff] (!%p414_p2)  ;;  %v497_v34 = vld [vmem:[%s4674_s4 + $0x50] sm:$0xff] (!%p414_p2)  ;;  %v498_v35 = vld [vmem:[%s4674_s4 + $0x58] sm:$0xff] (!%p414_p2)  ;;  %vm593_vm2 = vcmask (!%p414_p2), 1043456   ;;  %vm571_vm3 = vcmask (!%p414_p2), 195584   ;;  %vm580_vm4 = vcmask (!%p414_p2), 818176  }
   0x9   : > { %3209 = vmatprep.subr.bf16.mxu0 (!%p414_p2), %v3574_v1  ;;  %v3219_v33 = vpack.c.bf16 (!%p414_p2), %v496_v30, %v495_v29  ;;  %v3222_v38 = vpack.c.bf16 (!%p414_p2), %v498_v35, %v497_v34  ;;  %v499_v39 = vld [vmem:[%s4674_s4 + $0x60] sm:$0xff] (!%p414_p2)  ;;  %v500_v40 = vld [vmem:[%s4674_s4 + $0x68] sm:$0xff] (!%p414_p2)  ;;  %v501_v42 = vld [vmem:[%s4674_s4 + $0x70] sm:$0xff] (!%p414_p2)  ;;  %vm566_vm5 = vcmask (!%p414_p2), 621568   ;;  %v576_v30 = vlaneseq (!%p414_p2)  ;;  %s3578_s26 = smov (!%p414_p2), 32   ;;  %s3579_s30 = smov (!%p414_p2), 64  }
   0xa   : > { %v3225_v41 = vpack.c.bf16 (!%p414_p2), %v500_v40, %v499_v39  ;;  %v502_v43 = vld [vmem:[%s4674_s4 + $0x78] sm:$0xff] (!%p414_p2)  ;;  %v503_v45 = vld [vmem:[%s4674_s4 + $0x80] sm:$0xff] (!%p414_p2)  ;;  %v504_v46 = vld [vmem:[%s4674_s4 + $0x88] sm:$0xff] (!%p414_p2)  ;;  %vm747_vm6 = vcmask (!%p414_p2), 261120   ;;  %vm752_vm7 = vcmask (!%p414_p2), 523264   ;;  %vm761_vm8 = vcmask (!%p414_p2), 785408  }
   0xb   : > { %v3228_v44 = vpack.c.bf16 (!%p414_p2), %v502_v43, %v501_v42  ;;  %v3231_v47 = vpack.c.bf16 (!%p414_p2), %v504_v46, %v503_v45  ;;  %v505_v48 = vld [vmem:[%s4674_s4 + $0x90] sm:$0xff] (!%p414_p2)  ;;  %v506_v49 = vld [vmem:[%s4674_s4 + $0x98] sm:$0xff] (!%p414_p2)  ;;  %v507_v51 = vld [vmem:[%s4674_s4 + $0xa0] sm:$0xff] (!%p414_p2)  ;;  %vm1491_vm9 = vcmask (!%p414_p2), 1040384   ;;  %vm1478_vm10 = vcmask (!%p414_p2), 1041408  }
   0xc   : > { %3211 = vmatpush1.bf16.msra.mxu0 (!%p414_p2), %v3210_v6  ;;  %v3234_v50 = vpack.c.bf16 (!%p414_p2), %v506_v49, %v505_v48  ;;  %v508_v52 = vld [vmem:[%s4674_s4 + $0xa8] sm:$0xff] (!%p414_p2)  ;;  %v509_v54 = vld [vmem:[%s4674_s4 + $0xb0] sm:$0xff] (!%p414_p2)  ;;  %v510_v55 = vld [vmem:[%s4674_s4 + $0xb8] sm:$0xff] (!%p414_p2)  ;;  %vm2162_vm11 = vcmask (!%p414_p2), 1042432  }
   0xd   : > { %s4686_s15 = smov (!%p460_p3, %s2798_s15), 7  ;;  %3212 = vmatprep.subr.bf16.mxu0 %v3574_v1  ;;  %v3237_v53 = vpack.c.bf16 %v508_v52, %v507_v51  ;;  %v3240_v56 = vpack.c.bf16 %v510_v55, %v509_v54  ;;  %v511_v57 = vld [vmem:[%s4674_s4 + $0xc0] sm:$0xff]  ;;  %v512_v58 = vld [vmem:[%s4674_s4 + $0xc8] sm:$0xff]  ;;  %v513_v60 = vld [vmem:[%s4674_s4 + $0xd0] sm:$0xff] }
   0xe   : > { %s2799_s28 = sshll.u32 %s4686_s15, 3  ;;  %v3243_v59 = vpack.c.bf16 %v512_v58, %v511_v57  ;;  %v514_v61 = vld [vmem:[%s4674_s4 + $0xd8] sm:$0xff]  ;;  %v515_v0 = vld [vmem:[%s4674_s4 + $0xe0] sm:$0x1f]  ;;  %v695_v35 = vld [vmem:[%s4675_s5 + $0x48] sm:$0xff] }
   0xf   : > { %s463_s17 = scalar_lea.vmem %s4670_s0, %s2799_s28  ;;  %v3246_v62 = vpack.c.bf16 %v514_v61, %v513_v60  ;;  %v694_v34 = vld [vmem:[%s4675_s5 + $0x40] sm:$0xff]  ;;  %v696_v40 = vld [vmem:[%s4675_s5 + $0x50] sm:$0xff] }
  0x10   : > { %v3696_v9 = vld [vmem:[%s463_s17 + $0x8] sm:$0xff]  ;;  %v3698_v10 = vld [vmem:[%s463_s17 + $0x10] sm:$0xff]  ;;  %v3700_v11 = vld [vmem:[%s463_s17] sm:$0xff]  ;;  %3214 = vmatpush1.bf16.msra.mxu0 %v3213_v12 }
  0x11   : > { %v522_v13 = vrot.slane %v3696_v9, 1  ;;  %v524_v14 = vrot.slane %v3698_v10, 1  ;;  %v521_v15 = vrot.slane %v3700_v11, 1  ;;  %v532_v16 = vrot.slane %v3696_v9, 2  ;;  %v3714_v21 = vld [vmem:[%s463_s17 + $0x18] sm:$0xff]  ;;  %3215 = vmatprep.subr.bf16.mxu0 %v3574_v1  ;;  %s469_s17 = scalar_lea.vmem %s4684_s14, %s2799_s28 }
  0x12   : > { %v534_v19 = vrot.slane %v3698_v10, 2  ;;  %v531_v20 = vrot.slane %v3700_v11, 2  ;;  %v536_v27 = vrot.slane %v3714_v21, 2  ;;  %v526_v28 = vrot.slane %v3714_v21, 1 }
  0x13   : > { %v525_v22 = vsel %vm520_vm0, %v522_v13, %v524_v14  ;;  %v523_v23 = vsel %vm520_vm0, %v521_v15, %v522_v13 }
  0x14   : > { %543 = vrot.lane.b32.xlu1 %v525_v22, %s3575_s22  ;;  %541 = vrot.lane.b32.xlu0 %v523_v23, %s3575_s22  ;;  %v535_v25 = vsel %vm530_vm1, %v532_v16, %v534_v19  ;;  %v533_v26 = vsel %vm530_vm1, %v531_v20, %v532_v16  ;;  %v537_v31 = vsel %vm530_vm1, %v534_v19, %v536_v27  ;;  %v539_v36 = vsel %vm530_vm1, %v536_v27, 0.0  ;;  %v687_v20 = vld [vmem:[%s4675_s5 + $0x8] sm:$0xff]  ;;  %v689_v23 = vld [vmem:[%s4675_s5 + $0x18] sm:$0xff] }
  0x15   : > { %v527_v32 = vsel %vm520_vm0, %v524_v14, %v526_v28  ;;  %3217 = vmatpush1.bf16.msra.mxu0 %v3216_v24  ;;  %v529_v37 = vsel %vm520_vm0, %v526_v28, 0.0  ;;  %v692_v27 = vld [vmem:[%s4675_s5 + $0x30] sm:$0xff]  ;;  %v693_v28 = vld [vmem:[%s4675_s5 + $0x38] sm:$0xff] }
  0x16   : > { %3218 = vmatprep.subr.bf16.mxu0 %v3574_v1  ;;  %v3260_v29 = vpack.c.bf16 %v693_v28, %v692_v27 }
  0x18   : > { %556 = vrot.lane.b32.xlu1 %v535_v25, %s3576_s27  ;;  %554 = vrot.lane.b32.xlu0 %v533_v26, %s3576_s27  ;;  %v691_v25 = vld [vmem:[%s4675_s5 + $0x28] sm:$0xff] }
  0x19   : > { %3220 = vmatpush1.bf16.msra.mxu0 %v3219_v33 }
  0x1a   : > { %3221 = vmatprep.subr.bf16.mxu0 %v3574_v1 }
  0x1c   : > { %558 = vrot.lane.b32.xlu1 %v537_v31, %s3576_s27  ;;  %545 = vrot.lane.b32.xlu0 %v527_v32, %s3575_s22  ;;  %v577_v31 = vshrl.u32 %v576_v30, 7 }
  0x1d   : > { %3223 = vmatpush1.bf16.msra.mxu0 %v3222_v38 }
  0x1e   : > { %3224 = vmatprep.subr.bf16.mxu0 %v3574_v1  ;;  %v578_v32 = vsub.s32 4, %v577_v31 }
  0x20   : > { %560 = vrot.lane.b32.xlu1 %v539_v36, %s3576_s27  ;;  %547 = vrot.lane.b32.xlu0 %v529_v37, %s3575_s22  ;;  %v579_v33 = vrot.slane %v515_v0, %v578_v32  ;;  %v3264_v36 = vpack.c.bf16 %v695_v35, %v694_v34  ;;  %s3581_s22 = smov 96  }
  0x21   : > { %3226 = vmatpush1.bf16.msra.mxu0 %v3225_v41  ;;  %v697_v41 = vld [vmem:[%s4675_s5 + $0x58] sm:$0xff] }
  0x22   : > { %3227 = vmatprep.subr.bf16.mxu0 %v3574_v1  ;;  %v3268_v42 = vpack.c.bf16 %v697_v41, %v696_v40 }
  0x25   : > { %3229 = vmatpush1.bf16.msra.mxu0 %v3228_v44 }
  0x26   : > { %3230 = vmatprep.subr.bf16.mxu0 %v3574_v1 }
  0x29   : > { %3232 = vmatpush1.bf16.msra.mxu0 %v3231_v47 }
  0x2a   : > { %3233 = vmatprep.subr.bf16.mxu0 %v3574_v1 }
  0x2d   : > { %3235 = vmatpush1.bf16.msra.mxu0 %v3234_v50 }
  0x2e   : > { %3236 = vmatprep.subr.bf16.mxu0 %v3574_v1 }
  0x31   : > { %3238 = vmatpush1.bf16.msra.mxu0 %v3237_v53 }
  0x32   : > { %3239 = vmatprep.subr.bf16.mxu0 %v3574_v1 }
  0x35   : > { %3241 = vmatpush1.bf16.msra.mxu0 %v3240_v56 }
  0x36   : > { %3242 = vmatprep.subr.bf16.mxu0 %v3574_v1 }
  0x39   : > { %3244 = vmatpush1.bf16.msra.mxu0 %v3243_v59 }
  0x3a   : > { %3245 = vmatprep.subr.bf16.mxu0 %v3574_v1 }
  0x3d   : > { %3247 = vmatpush1.bf16.msra.mxu0 %v3246_v62 }
  0x3e   : > { %653 = vmatprep.subr.mxu0 %v3577_v63 }
  0x41   : > { %2802 = vmatpush1.msk.msra.mxu0 %vm593_vm2, %v515_v0 }
  0x42   : > { %3348 = vmatprep.subr.bf16.mxu0 %v3574_v1 }
  0x86   : > { %v544_v2 = vpop.permute.xlu1 %543  ;;  %v542_v3 = vpop.permute.xlu0 %541 }
  0x87   : > { %v567_v7 = vsel %vm566_vm5, %v3700_v11, %v542_v3  ;;  %v568_v15 = vsel %vm566_vm5, %v3696_v9, %v544_v2  ;;  %v686_v9 = vld [vmem:[%s4675_s5] sm:$0xff] }
  0x88   : > { %v3248_v22 = vpack.c.bf16 %v687_v20, %v686_v9 }
  0x8a   : > { %v557_v4 = vpop.permute.xlu1 %556  ;;  %v555_v5 = vpop.permute.xlu0 %554  ;;  %3249 = vmatprep.subr.bf16.mxu1 %v3248_v22 }
  0x8b   : > { %v572_v6 = vsel %vm571_vm3, %v542_v3, %v555_v5  ;;  %v573_v8 = vsel %vm571_vm3, %v544_v2, %v557_v4  ;;  %3251 = vmatpush3.bf16.msra.mxu1 %v3248_v22 }
  0x8c   : > { %2803 = vmatprep.mubr.msk.f32.mxu0 %vm580_vm4, %v572_v6 }
  0x8d   : > { %662 = vmatmul.mubr.f32.vlgmr.msra.gmra.mrb[0].mxu0 %v567_v7 }
  0x8e   : > { %2804 = vmatprep.mubr.msk.f32.mxu0 %vm580_vm4, %v573_v8  ;;  %v559_v12 = vpop.permute.xlu1 %558  ;;  %v546_v13 = vpop.permute.xlu0 %545 }
  0x8f   : > { %v574_v14 = vsel %vm571_vm3, %v546_v13, %v559_v12  ;;  %v569_v16 = vsel %vm566_vm5, %v3698_v10, %v546_v13  ;;  %v688_v10 = vld [vmem:[%s4675_s5 + $0x10] sm:$0xff] }
  0x90   : > { %v3252_v24 = vpack.c.bf16 %v689_v23, %v688_v10 }
  0x91   : > { %667 = vmatmul.mubr.f32.gmra.mrb[2].mxu0 %v568_v15 }
  0x92   : > { %2805 = vmatprep.mubr.msk.f32.mxu0 %vm580_vm4, %v574_v14  ;;  %v561_v17 = vpop.permute.xlu1 %560  ;;  %v548_v11 = vpop.permute.xlu0 %547  ;;  %3253 = vmatprep.subr.bf16.mxu1 %v3252_v24 }
  0x93   : > { %v575_v18 = vsel %vm571_vm3, %v548_v11, %v561_v17  ;;  %v570_v19 = vsel %vm566_vm5, %v3714_v21, %v548_v11  ;;  %v690_v21 = vld [vmem:[%s4675_s5 + $0x20] sm:$0xff]  ;;  %3255 = vmatpush3.bf16.msra.mxu1 %v3252_v24 }
  0x94   : > { %v3256_v26 = vpack.c.bf16 %v691_v25, %v690_v21  ;;  %v3890_v25 = vld [vmem:[%s4671_s1] sm:$0xff] }
  0x95   : > { %672 = vmatmul.mubr.f32.gmra.mrb[4].mxu0 %v569_v16 }
  0x96   : > { %2806 = vmatprep.mubr.msk.f32.mxu0 %vm580_vm4, %v575_v18  ;;  %3257 = vmatprep.subr.bf16.mxu1 %v3256_v26 }
  0x97   : > { %3259 = vmatpush3.bf16.msra.mxu1 %v3256_v26  ;;  %v2807_v26 = vld [vmem:[%s4675_s5 + $0x60] ss:$0 sm:$0xff] }
  0x98   : > { %3261 = vmatprep.subr.bf16.mxu1 %v3260_v29 }
  0x99   : > { %677 = vmatmul.mubr.f32.gmra.mrb[6].mxu0 %v570_v19 }
  0x9b   : > { %3263 = vmatpush3.bf16.msra.mxu1 %v3260_v29 }
  0x9c   : > { %3265 = vmatprep.subr.bf16.mxu1 %v3264_v36 }
  0x9f   : > { %3267 = vmatpush3.bf16.msra.mxu1 %v3264_v36 }
  0xa0   : > { %3269 = vmatprep.subr.bf16.mxu1 %v3268_v42 }
  0xa3   : > { %3271 = vmatpush3.bf16.msra.mxu1 %v3268_v42 }
 0x160   : > { %v663_v37 = vpop.f32.mrb[0].mxu0 }
 0x161   : > { %v664_v38 = vadd.f32 %v663_v37, %v579_v33  ;;  %v665_v39 = vpop.f32.mrb[1].mxu0 }
 0x163   : > { %v682_v44 = vmax.f32 %v664_v38, 0.0 }
 0x164   : > { %v668_v43 = vpop.f32.mrb[2].mxu0 }
 0x165   : > { %v669_v45 = vadd.f32 %v668_v43, %v579_v33  ;;  %v670_v46 = vpop.f32.mrb[3].mxu0  ;;  %v703_v49 = vrot.slane %v682_v44, 1  ;;  %v712_v57 = vrot.slane %v682_v44, 2 }
 0x167   : > { %v683_v47 = vmax.f32 %v669_v45, 0.0 }
 0x168   : > { %v673_v48 = vpop.f32.mrb[4].mxu0 }
 0x169   : > { %v704_v50 = vrot.slane %v683_v47, 1  ;;  %v674_v51 = vadd.f32 %v673_v48, %v579_v33  ;;  %v675_v52 = vpop.f32.mrb[5].mxu0  ;;  %v713_v53 = vrot.slane %v683_v47, 2 }
 0x16b   : > { %v684_v54 = vmax.f32 %v674_v51, 0.0  ;;  %v705_v55 = vsel %vm520_vm0, %v703_v49, %v704_v50  ;;  %v714_v63 = vsel %vm530_vm1, %v712_v57, %v713_v53  ;;  %v981_v57 = vld [vmem:[%s4676_s6 + $0x8] sm:$0xff] }
 0x16c   : > { %722 = vrot.lane.b32.xlu0 %v705_v55, %s3578_s26  ;;  %v678_v56 = vpop.f32.mrb[6].mxu0  ;;  %v3918_v55 = vld [vmem:[%s4671_s1 + $0x18] sm:$0xff] }
 0x16d   : > { %v706_v58 = vrot.slane %v684_v54, 1  ;;  %v679_v59 = vadd.f32 %v678_v56, %v579_v33  ;;  %v680_v60 = vpop.f32.mrb[7].mxu0  ;;  %v715_v61 = vrot.slane %v684_v54, 2  ;;  %v980_v56 = vld [vmem:[%s4676_s6] sm:$0xff] }
 0x16e   : > { %v983_v60 = vld [vmem:[%s4676_s6 + $0x18] sm:$0xff] }
 0x16f   : > { %v685_v62 = vmax.f32 %v679_v59, 0.0  ;;  %v707_v0 = vsel %vm520_vm0, %v704_v50, %v706_v58  ;;  %v716_v4 = vsel %vm530_vm1, %v713_v53, %v715_v61  ;;  %v3904_v53 = vld [vmem:[%s4671_s1 + $0x8] sm:$0xff]  ;;  %v3280_v59 = vpack.c.bf16 %v981_v57, %v980_v56  ;;  %v1158_v57 = vld [vmem:[%s4677_s7 + $0x20] sm:$0xff] }
 0x170   : > { %735 = vrot.lane.b32.xlu0 %v714_v63, %s3579_s30  ;;  %724 = vrot.lane.b32.xlu1 %v707_v0, %s3578_s26  ;;  %v985_v63 = vld [vmem:[%s4676_s6 + $0x28] sm:$0xff] }
 0x171   : > { %v708_v2 = vrot.slane %v685_v62, 1  ;;  %v717_v3 = vrot.slane %v685_v62, 2 }
 0x173   : > { %v709_v5 = vsel %vm520_vm0, %v706_v58, %v708_v2  ;;  %v711_v6 = vsel %vm520_vm0, %v708_v2, 0.0  ;;  %v718_v7 = vsel %vm530_vm1, %v715_v61, %v717_v3  ;;  %v720_v8 = vsel %vm530_vm1, %v717_v3, 0.0  ;;  %v982_v58 = vld [vmem:[%s4676_s6 + $0x10] sm:$0xff]  ;;  %v987_v3 = vld [vmem:[%s4676_s6 + $0x38] sm:$0xff] }
 0x174   : > { %737 = vrot.lane.b32.xlu1 %v716_v4, %s3579_s30  ;;  %726 = vrot.lane.b32.xlu0 %v709_v5, %s3578_s26  ;;  %v3284_v61 = vpack.c.bf16 %v983_v60, %v982_v58  ;;  %v986_v2 = vld [vmem:[%s4676_s6 + $0x30] sm:$0xff]  ;;  %v988_v5 = vld [vmem:[%s4676_s6 + $0x40] sm:$0xff] }
 0x175   : > { %v3292_v4 = vpack.c.bf16 %v987_v3, %v986_v2  ;;  %v1159_v58 = vld [vmem:[%s4677_s7 + $0x28] sm:$0xff]  ;;  %v1160_v60 = vld [vmem:[%s4677_s7 + $0x30] sm:$0xff] }
 0x176   : > { %v1164_v3 = vld [vmem:[%s4677_s7 + $0x50] sm:$0xff] }
 0x178   : > { %728 = vrot.lane.b32.xlu1 %v711_v6, %s3578_s26  ;;  %739 = vrot.lane.b32.xlu0 %v718_v7, %s3579_s30  ;;  %v989_v6 = vld [vmem:[%s4676_s6 + $0x48] sm:$0xff] }
 0x179   : > { %v3296_v7 = vpack.c.bf16 %v989_v6, %v988_v5  ;;  %v1166_v6 = vld [vmem:[%s4677_s7 + $0x60] sm:$0xff] }
 0x17c   : > { %741 = vrot.lane.b32.xlu1 %v720_v8, %s3579_s30  ;;  %v990_v8 = vld [vmem:[%s4676_s6 + $0x50] sm:$0xff] }
 0x1de   : > { %v723_v12 = vpop.permute.xlu0 %722 }
 0x1df   : > { %v748_v13 = vsel %vm747_vm6, %v682_v44, %v723_v12  ;;  %v991_v12 = vld [vmem:[%s4676_s6 + $0x58] sm:$0xff] }
 0x1e2   : > { %v725_v14 = vpop.permute.xlu1 %724  ;;  %v736_v15 = vpop.permute.xlu0 %735 }
 0x1e3   : > { %v753_v16 = vsel %vm752_vm7, %v748_v13, %v736_v15  ;;  %v749_v17 = vsel %vm747_vm6, %v683_v47, %v725_v14  ;;  %v3300_v13 = vpack.c.bf16 %v991_v12, %v990_v8  ;;  %v1168_v12 = vld [vmem:[%s4677_s7 + $0x70] sm:$0xff] }
 0x1e4   : > { %3042 = vmatprep.mubr.msk.f32.mxu1 %vm761_vm8, %v753_v16 }
 0x1e6   : > { %v738_v11 = vpop.permute.xlu1 %737  ;;  %v727_v18 = vpop.permute.xlu0 %726 }
 0x1e7   : > { %v754_v19 = vsel %vm752_vm7, %v749_v17, %v738_v11  ;;  %v750_v9 = vsel %vm747_vm6, %v684_v54, %v727_v18  ;;  %v3909_v54 = vld [vmem:[%s4671_s1 + $0x10] sm:$0xff] }
 0x1e8   : > { %3043 = vmatmul.mubr.msk.f32.vlgmr.msra.gmra.mrb[0].mxu1 %vm761_vm8, %v754_v19 }
 0x1ea   : > { %v729_v20 = vpop.permute.xlu1 %728  ;;  %v740_v10 = vpop.permute.xlu0 %739 }
 0x1eb   : > { %v755_v22 = vsel %vm752_vm7, %v750_v9, %v740_v10  ;;  %v751_v23 = vsel %vm747_vm6, %v685_v62, %v729_v20  ;;  %v984_v62 = vld [vmem:[%s4676_s6 + $0x20] sm:$0xff] }
 0x1ec   : > { %3045 = vmatprep.mubr.msk.f32.mxu1 %vm761_vm8, %v755_v22  ;;  %v3288_v0 = vpack.c.bf16 %v985_v63, %v984_v62  ;;  %v1162_v63 = vld [vmem:[%s4677_s7 + $0x40] sm:$0xff] }
 0x1ee   : > { %v742_v24 = vpop.permute.xlu1 %741 }
 0x1ef   : > { %v756_v21 = vsel %vm752_vm7, %v751_v23, %v742_v24 }
 0x1f0   : > { %3046 = vmatmul.mubr.msk.f32.gmra.mrb[2].mxu1 %vm761_vm8, %v756_v21 }
 0x1f1   : > { %3056 = vmatprep.mubr.msk.f32.mxu1 %vm747_vm6, %v3890_v25 }
 0x2bb   : > { %v3044_v27 = vpop.f32.mrb[0].mxu1 }
 0x2bc   : > { %v846_v28 = vadd.f32 %v3044_v27, %v2807_v26  ;;  %v840_v29 = vpop.f32.mrb[1].mxu1 }
 0x2bd   : > { %v841_v30 = vadd.f32 %v2807_v26, %v840_v29 }
 0x2be   : > { %v860_v31 = vmax.f32 %v846_v28, 0.0 }
 0x2bf   : > { %v859_v32 = vmax.f32 %v841_v30, 0.0 }
 0x2c0   : > { %v868_v33 = vrot.slane %v860_v31, 1 }
 0x2c1   : > { %v867_v34 = vrot.slane %v859_v32, 1 }
 0x2c3   : > { %v869_v35 = vsel %vm520_vm0, %v867_v34, %v868_v33  ;;  %v3047_v36 = vpop.f32.mrb[2].mxu1 }
 0x2c4   : > { %v879_v37 = vmax.f32 %v859_v32, %v869_v35  ;;  %v856_v38 = vadd.f32 %v3047_v36, %v2807_v26  ;;  %v850_v39 = vpop.f32.mrb[3].mxu1 }
 0x2c5   : > { %v851_v40 = vadd.f32 %v2807_v26, %v850_v39 }
 0x2c6   : > { %v862_v41 = vmax.f32 %v856_v38, 0.0 }
 0x2c7   : > { %v861_v42 = vmax.f32 %v851_v40, 0.0 }
 0x2c8   : > { %v872_v43 = vrot.slane %v862_v41, 1 }
 0x2c9   : > { %v870_v44 = vrot.slane %v861_v42, 1 }
 0x2ca   : > { %v878_v45 = vsel %vm520_vm0, %v872_v43, 0.0 }
 0x2cb   : > { %v882_v46 = vmax.f32 %v862_v41, %v878_v45  ;;  %v873_v47 = vsel %vm520_vm0, %v870_v44, %v872_v43  ;;  %v871_v48 = vsel %vm520_vm0, %v868_v33, %v870_v44 }
 0x2cc   : > { %v881_v49 = vmax.f32 %v861_v42, %v873_v47  ;;  %v880_v50 = vmax.f32 %v860_v31, %v871_v48  ;;  %v1154_v48 = vld [vmem:[%s4677_s7] sm:$0xff] }
 0x2ce   : > { %v3272_v51 = vpack.c.bf16 %v880_v50, %v879_v37  ;;  %v3276_v52 = vpack.c.bf16 %v882_v46, %v881_v49  ;;  %v1155_v49 = vld [vmem:[%s4677_s7 + $0x8] sm:$0xff]  ;;  %v1156_v50 = vld [vmem:[%s4677_s7 + $0x10] sm:$0xff] }
 0x2d0   : > { %3273 = vmatprep.subr.bf16.mxu1 %v3272_v51 }
 0x2d1   : > { %3275 = vmatpush3.bf16.msra.mxu1 %v3272_v51  ;;  %v3305_v51 = vpack.c.bf16 %v1155_v49, %v1154_v48 }
 0x2d2   : > { %3277 = vmatprep.subr.bf16.mxu1 %v3276_v52 }
 0x2d5   : > { %3279 = vmatpush3.bf16.msra.mxu1 %v3276_v52  ;;  %v1157_v52 = vld [vmem:[%s4677_s7 + $0x18] sm:$0xff] }
 0x2d6   : > { %3281 = vmatprep.subr.bf16.mxu1 %v3280_v59  ;;  %v3308_v56 = vpack.c.bf16 %v1157_v52, %v1156_v50 }
 0x2d8   : > { %3057 = vmatmul.mubr.msk.f32.vlgmr.msra.gmra.mrb[4].mxu1 %vm747_vm6, %v3904_v53 }
 0x2d9   : > { %3059 = vmatprep.mubr.msk.f32.mxu1 %vm747_vm6, %v3909_v54  ;;  %3283 = vmatpush3.bf16.msra.mxu1 %v3280_v59  ;;  %v3311_v59 = vpack.c.bf16 %v1159_v58, %v1158_v57 }
 0x2da   : > { %3285 = vmatprep.subr.bf16.mxu1 %v3284_v61 }
 0x2dc   : > { %3060 = vmatmul.mubr.msk.f32.gmra.mrb[6].mxu1 %vm747_vm6, %v3918_v55 }
 0x2dd   : > { %3287 = vmatpush3.bf16.msra.mxu1 %v3284_v61  ;;  %v1161_v61 = vld [vmem:[%s4677_s7 + $0x38] sm:$0xff] }
 0x2de   : > { %3289 = vmatprep.subr.bf16.mxu1 %v3288_v0  ;;  %v3314_v62 = vpack.c.bf16 %v1161_v61, %v1160_v60 }
 0x2e1   : > { %3291 = vmatpush3.bf16.msra.mxu1 %v3288_v0  ;;  %v1163_v0 = vld [vmem:[%s4677_s7 + $0x48] sm:$0xff] }
 0x2e2   : > { %3293 = vmatprep.subr.bf16.mxu1 %v3292_v4  ;;  %v3317_v2 = vpack.c.bf16 %v1163_v0, %v1162_v63 }
 0x2e5   : > { %3295 = vmatpush3.bf16.msra.mxu1 %v3292_v4  ;;  %v1165_v4 = vld [vmem:[%s4677_s7 + $0x58] sm:$0xff] }
 0x2e6   : > { %3297 = vmatprep.subr.bf16.mxu1 %v3296_v7  ;;  %v3320_v5 = vpack.c.bf16 %v1165_v4, %v1164_v3  ;;  %v4103_v3 = vld [vmem:[%s4673_s3 + $0x8] sm:$0xff]  ;;  %v3580_v4 = vmov 0  }
 0x2e7   : > { %3535 = vset.pattern.permute.xlu0 %v3580_v4  ;;  %3536 = vset.pattern.permute.xlu1 %v3580_v4  ;;  %v1443_v4 = vld [vmem:[%s4678_s8 + $0x90] sm:$0xff] }
 0x2e9   : > { %3299 = vmatpush3.bf16.msra.mxu1 %v3296_v7  ;;  %v1167_v7 = vld [vmem:[%s4677_s7 + $0x68] sm:$0xff] }
 0x2ea   : > { %3301 = vmatprep.subr.bf16.mxu1 %v3300_v13  ;;  %v3323_v8 = vpack.c.bf16 %v1167_v7, %v1166_v6  ;;  %v2821_v6 = vld [vmem:[%s4677_s7 + $0xc0] ss:$0 sm:$0xff] }
 0x2ed   : > { %3303 = vmatpush3.bf16.msra.mxu1 %v3300_v13  ;;  %v1169_v13 = vld [vmem:[%s4677_s7 + $0x78] sm:$0xff] }
 0x2ee   : > { %3304 = vmatprep.subr.bf16.mxu1 %v3574_v1 }
 0x3ab   : > { %v3058_v14 = vpop.f32.mrb[4].mxu1 }
 0x3ac   : > { %v998_v15 = vrot.slane %v3058_v14, 1  ;;  %v1007_v16 = vrot.slane %v3058_v14, 2  ;;  %v961_v17 = vpop.f32.mrb[5].mxu1 }
 0x3ad   : > { %v997_v11 = vrot.slane %v961_v17, 1  ;;  %v1006_v18 = vrot.slane %v961_v17, 2 }
 0x3af   : > { %v3061_v19 = vpop.f32.mrb[6].mxu1  ;;  %v999_v9 = vsel %vm520_vm0, %v997_v11, %v998_v15  ;;  %v1008_v20 = vsel %vm530_vm1, %v1006_v18, %v1007_v16  ;;  %v1172_v11 = vld [vmem:[%s4677_s7 + $0x90] sm:$0xff]  ;;  %v1173_v18 = vld [vmem:[%s4677_s7 + $0x98] sm:$0xff] }
 0x3b0   : > { %v1002_v10 = vrot.slane %v3061_v19, 1  ;;  %v1011_v22 = vrot.slane %v3061_v19, 2  ;;  %1016 = vrot.lane.b32.xlu0 %v999_v9, %s3578_s26  ;;  %v971_v23 = vpop.f32.mrb[7].mxu1  ;;  %v1174_v9 = vld [vmem:[%s4677_s7 + $0xa0] sm:$0xff] }
 0x3b1   : > { %v1000_v24 = vrot.slane %v971_v23, 1  ;;  %v1009_v21 = vrot.slane %v971_v23, 2 }
 0x3b2   : > { %v1005_v26 = vsel %vm520_vm0, %v1002_v10, 0.0  ;;  %v1014_v31 = vsel %vm530_vm1, %v1011_v22, 0.0 }
 0x3b3   : > { %1022 = vrot.lane.b32.xlu1 %v1005_v26, %s3578_s26  ;;  %v1001_v27 = vsel %vm520_vm0, %v998_v15, %v1000_v24  ;;  %v1003_v28 = vsel %vm520_vm0, %v1000_v24, %v1002_v10  ;;  %v1010_v29 = vsel %vm530_vm1, %v1007_v16, %v1009_v21  ;;  %v1012_v30 = vsel %vm530_vm1, %v1009_v21, %v1011_v22  ;;  %v1170_v15 = vld [vmem:[%s4677_s7 + $0x80] sm:$0xff]  ;;  %v1171_v16 = vld [vmem:[%s4677_s7 + $0x88] sm:$0xff]  ;;  %v1176_v22 = vld [vmem:[%s4677_s7 + $0xb0] sm:$0xff] }
 0x3b4   : > { %1029 = vrot.lane.b32.xlu0 %v1008_v20, %s3579_s30  ;;  %v1175_v20 = vld [vmem:[%s4677_s7 + $0xa8] sm:$0xff]  ;;  %v2816_v21 = vld [vmem:[%s4676_s6 + $0x60] ss:$0 sm:$0xff] }
 0x3b5   : > { %v3335_v10 = vpack.c.bf16 %v1175_v20, %v1174_v9 }
 0x3b7   : > { %1018 = vrot.lane.b32.xlu1 %v1001_v27, %s3578_s26 }
 0x3b8   : > { %1020 = vrot.lane.b32.xlu0 %v1003_v28, %s3578_s26 }
 0x3bb   : > { %1031 = vrot.lane.b32.xlu1 %v1010_v29, %s3579_s30 }
 0x3bc   : > { %1033 = vrot.lane.b32.xlu0 %v1012_v30, %s3579_s30 }
 0x3bf   : > { %1035 = vrot.lane.b32.xlu1 %v1014_v31, %s3579_s30 }
 0x422   : > { %v1017_v32 = vpop.permute.xlu0 %1016 }
 0x423   : > { %v1041_v34 = vsel %vm747_vm6, %v961_v17, %v1017_v32  ;;  %v3329_v17 = vpack.c.bf16 %v1171_v16, %v1170_v15 }
 0x425   : > { %v1023_v33 = vpop.permute.xlu1 %1022 }
 0x426   : > { %v1030_v35 = vpop.permute.xlu0 %1029  ;;  %v1044_v45 = vsel %vm747_vm6, %v3061_v19, %v1023_v33  ;;  %v3332_v19 = vpack.c.bf16 %v1173_v18, %v1172_v11 }
 0x427   : > { %v1045_v36 = vsel %vm752_vm7, %v1041_v34, %v1030_v35 }
 0x428   : > { %3086 = vmatprep.mubr.msk.f32.mxu1 %vm761_vm8, %v1045_v36 }
 0x429   : > { %v1019_v37 = vpop.permute.xlu1 %1018 }
 0x42a   : > { %v1021_v38 = vpop.permute.xlu0 %1020  ;;  %v1042_v39 = vsel %vm747_vm6, %v3058_v14, %v1019_v37  ;;  %v3326_v14 = vpack.c.bf16 %v1169_v13, %v1168_v12 }
 0x42b   : > { %v1043_v41 = vsel %vm747_vm6, %v971_v23, %v1021_v38  ;;  %v1177_v23 = vld [vmem:[%s4677_s7 + $0xb8] sm:$0xff] }
 0x42c   : > { %v3338_v24 = vpack.c.bf16 %v1177_v23, %v1176_v22 }
 0x42d   : > { %v1032_v40 = vpop.permute.xlu1 %1031 }
 0x42e   : > { %v1046_v42 = vsel %vm752_vm7, %v1042_v39, %v1032_v40  ;;  %v1034_v43 = vpop.permute.xlu0 %1033 }
 0x42f   : > { %v1047_v44 = vsel %vm752_vm7, %v1043_v41, %v1034_v43  ;;  %3087 = vmatmul.mubr.msk.f32.vlgmr.msra.gmra.mrb[8].mxu1 %vm761_vm8, %v1046_v42 }
 0x430   : > { %3089 = vmatprep.mubr.msk.f32.mxu1 %vm761_vm8, %v1047_v44  ;;  %3306 = vmatpush1.bf16.msra.mxu1 %v3305_v51 }
 0x431   : > { %v1036_v46 = vpop.permute.xlu1 %1035  ;;  %3307 = vmatprep.subr.bf16.mxu1 %v3574_v1 }
 0x432   : > { %v1048_v47 = vsel %vm752_vm7, %v1044_v45, %v1036_v46 }
 0x433   : > { %3090 = vmatmul.mubr.msk.f32.gmra.mrb[10].mxu1 %vm761_vm8, %v1048_v47 }
 0x434   : > { %3309 = vmatpush1.bf16.msra.mxu1 %v3308_v56 }
 0x435   : > { %3310 = vmatprep.subr.bf16.mxu1 %v3574_v1 }
 0x438   : > { %3312 = vmatpush1.bf16.msra.mxu1 %v3311_v59 }
 0x439   : > { %3313 = vmatprep.subr.bf16.mxu1 %v3574_v1 }
 0x43c   : > { %3315 = vmatpush1.bf16.msra.mxu1 %v3314_v62 }
 0x43d   : > { %3316 = vmatprep.subr.bf16.mxu1 %v3574_v1 }
 0x440   : > { %3318 = vmatpush1.bf16.msra.mxu1 %v3317_v2  ;;  %v4098_v2 = vld [vmem:[%s4673_s3] sm:$0xff] }
 0x441   : > { %3319 = vmatprep.subr.bf16.mxu1 %v3574_v1 }
 0x444   : > { %3321 = vmatpush1.bf16.msra.mxu1 %v3320_v5  ;;  %v4115_v5 = vld [vmem:[%s4673_s3 + $0x10] sm:$0xff] }
 0x445   : > { %3322 = vmatprep.subr.bf16.mxu1 %v3574_v1 }
 0x448   : > { %3324 = vmatpush1.bf16.msra.mxu1 %v3323_v8 }
 0x449   : > { %3325 = vmatprep.subr.bf16.mxu1 %v3574_v1 }
 0x44c   : > { %3327 = vmatpush1.bf16.msra.mxu1 %v3326_v14 }
 0x44d   : > { %3328 = vmatprep.subr.bf16.mxu1 %v3574_v1 }
 0x450   : > { %3330 = vmatpush1.bf16.msra.mxu1 %v3329_v17 }
 0x451   : > { %3331 = vmatprep.subr.bf16.mxu1 %v3574_v1 }
 0x454   : > { %3333 = vmatpush1.bf16.msra.mxu1 %v3332_v19 }
 0x455   : > { %3334 = vmatprep.subr.bf16.mxu1 %v3574_v1 }
 0x458   : > { %3336 = vmatpush1.bf16.msra.mxu1 %v3335_v10 }
 0x459   : > { %3337 = vmatprep.subr.bf16.mxu1 %v3574_v1 }
 0x45c   : > { %3339 = vmatpush1.bf16.msra.mxu1 %v3338_v24 }
 0x502   : > { %v3088_v26 = vpop.f32.mrb[8].mxu1 }
 0x503   : > { %v1137_v27 = vadd.f32 %v3088_v26, %v2816_v21  ;;  %v1131_v28 = vpop.f32.mrb[9].mxu1 }
 0x504   : > { %v1132_v29 = vadd.f32 %v2816_v21, %v1131_v28 }
 0x505   : > { %v1151_v30 = vmax.f32 %v1137_v27, 0.0 }
 0x506   : > { %v1150_v31 = vmax.f32 %v1132_v29, 0.0  ;;  %v3091_v32 = vpop.f32.mrb[10].mxu1 }
 0x507   : > { %v1184_v33 = vrot.slane %v1151_v30, 1  ;;  %v1193_v34 = vrot.slane %v1151_v30, 2  ;;  %v1147_v35 = vadd.f32 %v3091_v32, %v2816_v21  ;;  %v1141_v36 = vpop.f32.mrb[11].mxu1 }
 0x508   : > { %v1183_v37 = vrot.slane %v1150_v31, 1  ;;  %v1192_v38 = vrot.slane %v1150_v31, 2  ;;  %v1142_v39 = vadd.f32 %v2816_v21, %v1141_v36 }
 0x509   : > { %v1153_v40 = vmax.f32 %v1147_v35, 0.0 }
 0x50a   : > { %v1152_v41 = vmax.f32 %v1142_v39, 0.0  ;;  %v1185_v42 = vsel %vm520_vm0, %v1183_v37, %v1184_v33  ;;  %v1194_v43 = vsel %vm530_vm1, %v1192_v38, %v1193_v34  ;;  %v1425_v38 = vld [vmem:[%s4678_s8] sm:$0xff]  ;;  %v1426_v39 = vld [vmem:[%s4678_s8 + $0x8] sm:$0xff] }
 0x50b   : > { %v1188_v44 = vrot.slane %v1153_v40, 1  ;;  %1202 = vrot.lane.b32.xlu0 %v1185_v42, %s3579_s30  ;;  %2822 = vmatprep.mubr.msk.f32.mxu1 %vm752_vm7, %v1194_v43  ;;  %v1197_v52 = vrot.slane %v1153_v40, 2  ;;  %v1430_v42 = vld [vmem:[%s4678_s8 + $0x28] sm:$0xff] }
 0x50c   : > { %v1186_v45 = vrot.slane %v1152_v41, 1  ;;  %v1195_v49 = vrot.slane %v1152_v41, 2 }
 0x50d   : > { %v1191_v48 = vsel %vm520_vm0, %v1188_v44, 0.0  ;;  %v1200_v63 = vsel %vm530_vm1, %v1197_v52, 0.0 }
 0x50e   : > { %v1189_v46 = vsel %vm520_vm0, %v1186_v45, %v1188_v44  ;;  %v1187_v47 = vsel %vm520_vm0, %v1184_v33, %v1186_v45  ;;  %v1196_v56 = vsel %vm530_vm1, %v1193_v34, %v1195_v49  ;;  %v1198_v60 = vsel %vm530_vm1, %v1195_v49, %v1197_v52  ;;  %v1431_v44 = vld [vmem:[%s4678_s8 + $0x30] sm:$0xff]  ;;  %v1432_v45 = vld [vmem:[%s4678_s8 + $0x38] sm:$0xff] }
 0x50f   : > { %1206 = vrot.lane.b32.xlu0 %v1189_v46, %s3579_s30  ;;  %1204 = vrot.lane.b32.xlu1 %v1187_v47, %s3579_s30  ;;  %v3358_v46 = vpack.c.bf16 %v1432_v45, %v1431_v44  ;;  %v1433_v47 = vld [vmem:[%s4678_s8 + $0x40] sm:$0xff] }
 0x513   : > { %1208 = vrot.lane.b32.xlu1 %v1191_v48, %s3579_s30  ;;  %1452 = vperm.xlu0 %3535, %v4098_v2   ;;  %v1434_v48 = vld [vmem:[%s4678_s8 + $0x48] sm:$0xff] }
 0x514   : > { %v3361_v49 = vpack.c.bf16 %v1434_v48, %v1433_v47  ;;  %v1619_v48 = vld [vmem:[%s4679_s9] sm:$0xff] }
 0x517   : > { %1457 = vperm.xlu1 %3536, %v4103_v3  }
 0x51b   : > { %1462 = vperm.xlu1 %3536, %v4115_v5  }
 0x57d   : > { %v1203_v50 = vpop.permute.xlu0 %1202 }
 0x57e   : > { %v1214_v51 = vsel %vm752_vm7, %v1150_v31, %v1203_v50  ;;  %v1435_v50 = vld [vmem:[%s4678_s8 + $0x50] sm:$0xff] }
 0x57f   : > { %1296 = vmatmul.mubr.f32.vlgmr.msra.gmra.mrb[12].mxu1 %v1214_v51  ;;  %v1436_v51 = vld [vmem:[%s4678_s8 + $0x58] sm:$0xff] }
 0x580   : > { %2823 = vmatprep.mubr.msk.f32.mxu1 %vm752_vm7, %v1196_v56  ;;  %v3364_v52 = vpack.c.bf16 %v1436_v51, %v1435_v50  ;;  %v1437_v56 = vld [vmem:[%s4678_s8 + $0x60] sm:$0xff]  ;;  %v1621_v51 = vld [vmem:[%s4679_s9 + $0x10] sm:$0xff] }
 0x581   : > { %v1205_v57 = vpop.permute.xlu1 %1204  ;;  %v1207_v59 = vpop.permute.xlu0 %1206 }
 0x582   : > { %v1215_v58 = vsel %vm752_vm7, %v1151_v30, %v1205_v57  ;;  %v1216_v61 = vsel %vm752_vm7, %v1152_v41, %v1207_v59  ;;  %v3349_v41 = vpack.c.bf16 %v1426_v39, %v1425_v38  ;;  %v1438_v57 = vld [vmem:[%s4678_s8 + $0x68] sm:$0xff]  ;;  %v1439_v59 = vld [vmem:[%s4678_s8 + $0x70] sm:$0xff] }
 0x583   : > { %1301 = vmatmul.mubr.f32.gmra.mrb[14].mxu1 %v1215_v58  ;;  %v3367_v58 = vpack.c.bf16 %v1438_v57, %v1437_v56  ;;  %v2830_v57 = vld [vmem:[%s4678_s8 + $0xc0] ss:$0 sm:$0xff] }
 0x584   : > { %2824 = vmatprep.mubr.msk.f32.mxu1 %vm752_vm7, %v1198_v60  ;;  %3350 = vmatpush1.bf16.msra.mxu0 %v3349_v41  ;;  %v1440_v60 = vld [vmem:[%s4678_s8 + $0x78] sm:$0xff] }
 0x585   : > { %v1209_v62 = vpop.permute.xlu1 %1208  ;;  %3351 = vmatprep.subr.bf16.mxu0 %v3574_v1 }
 0x586   : > { %v1217_v0 = vsel %vm752_vm7, %v1153_v40, %v1209_v62  ;;  %v1427_v40 = vld [vmem:[%s4678_s8 + $0x10] sm:$0xff]  ;;  %v1441_v62 = vld [vmem:[%s4678_s8 + $0x80] sm:$0xff] }
 0x587   : > { %1306 = vmatmul.mubr.f32.gmra.mrb[16].mxu1 %v1216_v61  ;;  %v3370_v61 = vpack.c.bf16 %v1440_v60, %v1439_v59 }
 0x588   : > { %2825 = vmatprep.mubr.msk.f32.mxu1 %vm752_vm7, %v1200_v63  ;;  %v1442_v63 = vld [vmem:[%s4678_s8 + $0x88] sm:$0xff] }
 0x58b   : > { %1311 = vmatmul.mubr.f32.gmra.mrb[18].mxu1 %v1217_v0  ;;  %v3373_v0 = vpack.c.bf16 %v1442_v63, %v1441_v62 }
 0x58c   : > { %3100 = vmatprep.mubr.msk.f32.mxu1 %vm747_vm6, %v3890_v25  ;;  %v4110_v25 = vld [vmem:[%s4673_s3 + $0x18] sm:$0xff] }
 0x58d   : > { %1467 = vperm.xlu0 %3535, %v4110_v25  }
 0x652   : > { %v1297_v7 = vpop.f32.mrb[12].mxu1 }
 0x653   : > { %v1298_v8 = vadd.f32 %v2821_v6, %v1297_v7  ;;  %v1299_v12 = vpop.f32.mrb[13].mxu1 }
 0x654   : > { %v1446_v12 = vld [vmem:[%s4678_s8 + $0xa8] sm:$0xff] }
 0x655   : > { %v1316_v14 = vmax.f32 %v1298_v8, 0.0  ;;  %v1445_v8 = vld [vmem:[%s4678_s8 + $0xa0] sm:$0xff] }
 0x656   : > { %v1302_v13 = vpop.f32.mrb[14].mxu1 }
 0x657   : > { %v1303_v15 = vadd.f32 %v2821_v6, %v1302_v13  ;;  %v1304_v16 = vpop.f32.mrb[15].mxu1  ;;  %v1324_v18 = vrot.slane %v1316_v14, 1  ;;  %v3379_v13 = vpack.c.bf16 %v1446_v12, %v1445_v8 }
 0x659   : > { %v1317_v17 = vmax.f32 %v1303_v15, 0.0  ;;  %v1448_v15 = vld [vmem:[%s4678_s8 + $0xb8] sm:$0xff] }
 0x65a   : > { %v1307_v11 = vpop.f32.mrb[16].mxu1 }
 0x65b   : > { %v1325_v19 = vrot.slane %v1317_v17, 1  ;;  %v1308_v9 = vadd.f32 %v2821_v6, %v1307_v11  ;;  %v1309_v20 = vpop.f32.mrb[17].mxu1  ;;  %v1453_v11 = vpop.permute.xlu0 %1452 }
 0x65d   : > { %v1318_v10 = vmax.f32 %v1308_v9, 0.0  ;;  %v1326_v22 = vsel %vm520_vm0, %v1324_v18, %v1325_v19 }
 0x65e   : > { %v1312_v23 = vpop.f32.mrb[18].mxu1  ;;  %v1336_v24 = vmax.f32 %v1316_v14, %v1326_v22  ;;  %v1447_v14 = vld [vmem:[%s4678_s8 + $0xb0] sm:$0xff] }
 0x65f   : > { %v1327_v21 = vrot.slane %v1318_v10, 1  ;;  %v1313_v26 = vadd.f32 %v2821_v6, %v1312_v23  ;;  %v1314_v27 = vpop.f32.mrb[19].mxu1  ;;  %v1444_v6 = vld [vmem:[%s4678_s8 + $0x98] sm:$0xff]  ;;  %v3382_v16 = vpack.c.bf16 %v1448_v15, %v1447_v14  ;;  %v1468_v23 = vpop.permute.xlu0 %1467 }
 0x660   : > { %v3376_v7 = vpack.c.bf16 %v1444_v6, %v1443_v4 }
 0x661   : > { %v1319_v28 = vmax.f32 %v1313_v26, 0.0  ;;  %v1328_v29 = vsel %vm520_vm0, %v1325_v19, %v1327_v21 }
 0x662   : > { %v1337_v30 = vmax.f32 %v1317_v17, %v1328_v29  ;;  %v1458_v17 = vpop.permute.xlu1 %1457 }
 0x663   : > { %v1329_v31 = vrot.slane %v1319_v28, 1 }
 0x664   : > { %v3340_v32 = vpack.c.bf16 %v1337_v30, %v1336_v24 }
 0x665   : > { %v1335_v33 = vsel %vm520_vm0, %v1329_v31, 0.0  ;;  %v1330_v34 = vsel %vm520_vm0, %v1327_v21, %v1329_v31 }
 0x666   : > { %v1339_v35 = vmax.f32 %v1319_v28, %v1335_v33  ;;  %3341 = vmatprep.subr.bf16.mxu1 %v3340_v32  ;;  %v1338_v36 = vmax.f32 %v1318_v10, %v1330_v34  ;;  %v1463_v22 = vpop.permute.xlu1 %1462 }
 0x667   : > { %3343 = vmatpush3.bf16.msra.mxu1 %v3340_v32 }
 0x668   : > { %v3344_v37 = vpack.c.bf16 %v1339_v35, %v1338_v36 }
 0x66a   : > { %3345 = vmatprep.subr.bf16.mxu1 %v3344_v37 }
 0x66b   : > { %3347 = vmatpush3.bf16.msra.mxu1 %v3344_v37 }
 0x66e   : > { %3101 = vmatmul.mubr.msk.f32.vlgmr.msra.gmra.mrb[20].mxu1 %vm747_vm6, %v3904_v53  ;;  %v1428_v53 = vld [vmem:[%s4678_s8 + $0x18] sm:$0xff] }
 0x66f   : > { %3103 = vmatprep.mubr.msk.f32.mxu1 %vm747_vm6, %v3909_v54  ;;  %v3352_v54 = vpack.c.bf16 %v1428_v53, %v1427_v40 }
 0x671   : > { %3353 = vmatpush1.bf16.msra.mxu0 %v3352_v54 }
 0x672   : > { %3104 = vmatmul.mubr.msk.f32.gmra.mrb[22].mxu1 %vm747_vm6, %v3918_v55  ;;  %v1429_v55 = vld [vmem:[%s4678_s8 + $0x20] sm:$0xff]  ;;  %3354 = vmatprep.subr.bf16.mxu0 %v3574_v1 }
 0x673   : > { %v3355_v43 = vpack.c.bf16 %v1430_v42, %v1429_v55 }
 0x675   : > { %3356 = vmatpush1.bf16.msra.mxu0 %v3355_v43 }
 0x676   : > { %3357 = vmatprep.subr.bf16.mxu0 %v3574_v1 }
 0x679   : > { %3359 = vmatpush1.bf16.msra.mxu0 %v3358_v46 }
 0x67a   : > { %3360 = vmatprep.subr.bf16.mxu0 %v3574_v1 }
 0x67d   : > { %3362 = vmatpush1.bf16.msra.mxu0 %v3361_v49  ;;  %v1620_v49 = vld [vmem:[%s4679_s9 + $0x8] sm:$0xff] }
 0x67e   : > { %3363 = vmatprep.subr.bf16.mxu0 %v3574_v1  ;;  %v3384_v50 = vpack.c.bf16 %v1620_v49, %v1619_v48 }
 0x680   : > { %3385 = vmatprep.subr.bf16.mxu1 %v3384_v50 }
 0x681   : > { %3365 = vmatpush1.bf16.msra.mxu0 %v3364_v52  ;;  %3387 = vmatpush3.bf16.msra.mxu1 %v3384_v50  ;;  %v1622_v52 = vld [vmem:[%s4679_s9 + $0x18] sm:$0xff] }
 0x682   : > { %3366 = vmatprep.subr.bf16.mxu0 %v3574_v1  ;;  %v3388_v56 = vpack.c.bf16 %v1622_v52, %v1621_v51 }
 0x684   : > { %3389 = vmatprep.subr.bf16.mxu1 %v3388_v56 }
 0x685   : > { %3368 = vmatpush1.bf16.msra.mxu0 %v3367_v58  ;;  %3391 = vmatpush3.bf16.msra.mxu1 %v3388_v56 }
 0x686   : > { %3369 = vmatprep.subr.bf16.mxu0 %v3574_v1 }
 0x689   : > { %3371 = vmatpush1.bf16.msra.mxu0 %v3370_v61 }
 0x68a   : > { %3372 = vmatprep.subr.bf16.mxu0 %v3574_v1 }
 0x68d   : > { %3374 = vmatpush1.bf16.msra.mxu0 %v3373_v0 }
 0x68e   : > { %3375 = vmatprep.subr.bf16.mxu0 %v3574_v1 }
 0x691   : > { %3377 = vmatpush1.bf16.msra.mxu0 %v3376_v7 }
 0x692   : > { %3378 = vmatprep.subr.bf16.mxu0 %v3574_v1 }
 0x695   : > { %3380 = vmatpush1.bf16.msra.mxu0 %v3379_v13 }
 0x696   : > { %3381 = vmatprep.subr.bf16.mxu0 %v3574_v1 }
 0x699   : > { %3383 = vmatpush1.bf16.msra.mxu0 %v3382_v16 }
 0x741   : > { %v3102_v18 = vpop.f32.mrb[20].mxu1 }
 0x742   : > { %v1471_v19 = vmul.f32 %v3102_v18, %v1458_v17  ;;  %v1406_v9 = vpop.f32.mrb[21].mxu1  ;;  %v479_v17 = vld [vmem:[%s4672_s2] sm:$0xff] }
 0x743   : > { %v1470_v20 = vmul.f32 %v1453_v11, %v1406_v9 }
 0x744   : > { %v1493_v10 = vrot.slane %v1471_v19, 7  ;;  %v1480_v36 = vrot.slane %v1471_v19, 6 }
 0x745   : > { %v3105_v24 = vpop.f32.mrb[22].mxu1  ;;  %2831 = vmatprep.mubr.msk.f32.mxu0 %vm752_vm7, %v1470_v20  ;;  %v1492_v21 = vrot.slane %v1470_v20, 7  ;;  %v1479_v35 = vrot.slane %v1470_v20, 6 }
 0x746   : > { %v1473_v26 = vmul.f32 %v3105_v24, %v1468_v23  ;;  %v1416_v27 = vpop.f32.mrb[23].mxu1  ;;  %v4267_v23 = vld [vmem:[%s4672_s2 + $0x10] sm:$0xff]  ;;  %v4276_v24 = vld [vmem:[%s4672_s2 + $0x18] sm:$0xff] }
 0x747   : > { %v1472_v28 = vmul.f32 %v1463_v22, %v1416_v27  ;;  %v1500_v29 = vsel %vm1491_vm9, 0.0, %v1492_v21  ;;  %v1494_v30 = vsel %vm1491_vm9, %v1492_v21, %v1493_v10  ;;  %v1490_v37 = vsel %vm1478_vm10, 0.0, %v1479_v35  ;;  %v4262_v22 = vld [vmem:[%s4672_s2 + $0x8] sm:$0xff]  ;;  %v1858_v21 = vld [vmem:[%s4680_s10] sm:$0xff] }
 0x748   : > { %v1497_v31 = vrot.slane %v1473_v26, 7  ;;  %1502 = vrot.lane.b32.xlu1 %v1500_v29, %s3579_s30  ;;  %1504 = vrot.lane.b32.xlu0 %v1494_v30, %s3579_s30  ;;  %v1481_v53 = vsel %vm1478_vm10, %v1479_v35, %v1480_v36  ;;  %v1484_v42 = vrot.slane %v1473_v26, 6  ;;  %v1861_v29 = vld [vmem:[%s4680_s10 + $0x18] sm:$0xff] }
 0x749   : > { %v1495_v32 = vrot.slane %v1472_v28, 7  ;;  %v1482_v41 = vrot.slane %v1472_v28, 6 }
 0x74b   : > { %v1498_v33 = vsel %vm1491_vm9, %v1495_v32, %v1497_v31  ;;  %v1496_v34 = vsel %vm1491_vm9, %v1493_v10, %v1495_v32  ;;  %v1483_v43 = vsel %vm1478_vm10, %v1480_v36, %v1482_v41  ;;  %v1485_v46 = vsel %vm1478_vm10, %v1482_v41, %v1484_v42 }
 0x74c   : > { %1508 = vrot.lane.b32.xlu0 %v1498_v33, %s3579_s30  ;;  %1506 = vrot.lane.b32.xlu1 %v1496_v34, %s3579_s30 }
 0x7ba   : > { %v1503_v38 = vpop.permute.xlu1 %1502  ;;  %v1505_v40 = vpop.permute.xlu0 %1504 }
 0x7bb   : > { %v1514_v39 = vsel %vm752_vm7, %v1490_v37, %v1503_v38  ;;  %v1515_v54 = vsel %vm752_vm7, %v1481_v53, %v1505_v40 }
 0x7bc   : > { %1595 = vmatmul.mubr.f32.vlgmr.msra.gmra.mrb[8].mxu0 %v1514_v39 }
 0x7bd   : > { %2832 = vmatprep.mubr.msk.f32.mxu0 %vm752_vm7, %v1471_v19 }
 0x7be   : > { %v1507_v55 = vpop.permute.xlu1 %1506  ;;  %v1509_v45 = vpop.permute.xlu0 %1508 }
 0x7bf   : > { %v1516_v44 = vsel %vm752_vm7, %v1483_v43, %v1507_v55  ;;  %v1517_v47 = vsel %vm752_vm7, %v1485_v46, %v1509_v45 }
 0x7c0   : > { %1600 = vmatmul.mubr.f32.gmra.mrb[10].mxu0 %v1515_v54  ;;  %v2843_v54 = vld [vmem:[%s4679_s9 + $0x20] ss:$0 sm:$0xff] }
 0x7c1   : > { %2833 = vmatprep.mubr.msk.f32.mxu0 %vm752_vm7, %v1472_v28  ;;  %v1860_v28 = vld [vmem:[%s4680_s10 + $0x10] sm:$0xff] }
 0x7c2   : > { %v3404_v30 = vpack.c.bf16 %v1861_v29, %v1860_v28  ;;  %v2123_v28 = vld [vmem:[%s4681_s11 + $0x130] sm:$0xff]  ;;  %v2124_v29 = vld [vmem:[%s4681_s11 + $0x138] sm:$0xff] }
 0x7c4   : > { %1605 = vmatmul.mubr.f32.gmra.mrb[12].mxu0 %v1516_v44 }
 0x7c5   : > { %2834 = vmatprep.mubr.msk.f32.mxu0 %vm752_vm7, %v1473_v26  ;;  %v1859_v26 = vld [vmem:[%s4680_s10 + $0x8] sm:$0xff] }
 0x7c6   : > { %v3400_v27 = vpack.c.bf16 %v1859_v26, %v1858_v21  ;;  %v2121_v21 = vld [vmem:[%s4681_s11 + $0x120] sm:$0xff]  ;;  %v2122_v26 = vld [vmem:[%s4681_s11 + $0x128] sm:$0xff] }
 0x7c8   : > { %1610 = vmatmul.mubr.f32.gmra.mrb[14].mxu0 %v1517_v47 }
 0x7c9   : > { %3156 = vmatprep.mubr.msk.f32.mxu0 %vm747_vm6, %v479_v17 }
 0x88f   : > { %v1596_v58 = vpop.f32.mrb[8].mxu0 }
 0x890   : > { %v1597_v59 = vadd.f32 %v2830_v57, %v1596_v58  ;;  %v1598_v60 = vpop.f32.mrb[9].mxu0 }
 0x891   : > { %v3582_v60 = vmov 1  }
 0x892   : > { %v1615_v61 = vmax.f32 %v1597_v59, 0.0  ;;  %3537 = vset.pattern.permute.xlu0 %v3582_v60  ;;  %3538 = vset.pattern.permute.xlu1 %v3582_v60  ;;  %v2111_v60 = vld [vmem:[%s4681_s11 + $0xd0] sm:$0xff] }
 0x893   : > { %v1601_v62 = vpop.f32.mrb[10].mxu0 }
 0x894   : > { %v1602_v63 = vadd.f32 %v2830_v57, %v1601_v62  ;;  %v1603_v0 = vpop.f32.mrb[11].mxu0  ;;  %3114 = vmatprep.mubr.msk.f32.mxu1 %vm747_vm6, %v1615_v61 }
 0x896   : > { %v1616_v4 = vmax.f32 %v1602_v63, 0.0 }
 0x897   : > { %v1606_v6 = vpop.f32.mrb[12].mxu0 }
 0x898   : > { %v1607_v7 = vadd.f32 %v2830_v57, %v1606_v6  ;;  %v1608_v8 = vpop.f32.mrb[13].mxu0  ;;  %3115 = vmatmul.mubr.msk.f32.vlgmr.msra.gmra.mrb[24].mxu1 %vm747_vm6, %v1616_v4 }
 0x899   : > { %v2117_v8 = vld [vmem:[%s4681_s11 + $0x100] sm:$0xff] }
 0x89a   : > { %v1617_v12 = vmax.f32 %v1607_v7, 0.0 }
 0x89b   : > { %v1611_v13 = vpop.f32.mrb[14].mxu0 }
 0x89c   : > { %v1612_v14 = vadd.f32 %v2830_v57, %v1611_v13  ;;  %v1613_v15 = vpop.f32.mrb[15].mxu0  ;;  %3117 = vmatprep.mubr.msk.f32.mxu1 %vm747_vm6, %v1617_v12  ;;  %v2118_v12 = vld [vmem:[%s4681_s11 + $0x108] sm:$0xff] }
 0x89d   : > { %v3448_v15 = vpack.c.bf16 %v2118_v12, %v2117_v8  ;;  %v2114_v8 = vld [vmem:[%s4681_s11 + $0xe8] sm:$0xff] }
 0x89e   : > { %v1618_v16 = vmax.f32 %v1612_v14, 0.0 }
 0x8a0   : > { %3118 = vmatmul.mubr.msk.f32.gmra.mrb[26].mxu1 %vm747_vm6, %v1618_v16 }
 0x8a1   : > { %3128 = vmatprep.mubr.msk.f32.mxu1 %vm747_vm6, %v479_v17 }
 0x96b   : > { %v3116_v11 = vpop.f32.mrb[24].mxu1 }
 0x96c   : > { %v1702_v18 = vpop.f32.mrb[25].mxu1 }
 0x96d   : > { %v3392_v19 = vpack.c.bf16 %v3116_v11, %v1702_v18 }
 0x96f   : > { %3393 = vmatprep.subr.bf16.mxu1 %v3392_v19 }
 0x970   : > { %3395 = vmatpush3.bf16.msra.mxu1 %v3392_v19 }
 0x973   : > { %v3119_v9 = vpop.f32.mrb[26].mxu1 }
 0x974   : > { %v1712_v20 = vpop.f32.mrb[27].mxu1 }
 0x975   : > { %v3396_v10 = vpack.c.bf16 %v3119_v9, %v1712_v20  ;;  %v2119_v20 = vld [vmem:[%s4681_s11 + $0x110] sm:$0xff] }
 0x977   : > { %3397 = vmatprep.subr.bf16.mxu1 %v3396_v10 }
 0x978   : > { %3399 = vmatpush3.bf16.msra.mxu1 %v3396_v10  ;;  %v2120_v10 = vld [vmem:[%s4681_s11 + $0x118] sm:$0xff] }
 0x979   : > { %3401 = vmatprep.subr.bf16.mxu1 %v3400_v27 }
 0x97b   : > { %3129 = vmatmul.mubr.msk.f32.vlgmr.msra.gmra.mrb[28].mxu1 %vm747_vm6, %v4262_v22 }
 0x97c   : > { %3131 = vmatprep.mubr.msk.f32.mxu1 %vm747_vm6, %v4267_v23  ;;  %3403 = vmatpush3.bf16.msra.mxu1 %v3400_v27  ;;  %v3456_v27 = vpack.c.bf16 %v2122_v26, %v2121_v21  ;;  %v2100_v21 = vld [vmem:[%s4681_s11 + $0x78] sm:$0xff] }
 0x97d   : > { %3405 = vmatprep.subr.bf16.mxu1 %v3404_v30 }
 0x97f   : > { %3132 = vmatmul.mubr.msk.f32.gmra.mrb[30].mxu1 %vm747_vm6, %v4276_v24 }
 0x980   : > { %3407 = vmatpush3.bf16.msra.mxu1 %v3404_v30  ;;  %v3460_v30 = vpack.c.bf16 %v2124_v29, %v2123_v28 }
 0xa4e   : > { %v3130_v31 = vpop.f32.mrb[28].mxu1 }
 0xa4f   : > { %v1823_v32 = vrot.slane %v3130_v31, 7  ;;  %v1799_v33 = vpop.f32.mrb[29].mxu1 }
 0xa50   : > { %v1822_v34 = vrot.slane %v1799_v33, 7 }
 0xa52   : > { %1829 = vrot.lane.b32.xlu1 %v1822_v34, %s3581_s22  ;;  %v3133_v35 = vpop.f32.mrb[30].mxu1  ;;  %v1824_v36 = vsel %vm1491_vm9, %v1822_v34, %v1823_v32 }
 0xa53   : > { %v1827_v37 = vrot.slane %v3133_v35, 7  ;;  %1831 = vrot.lane.b32.xlu0 %v1824_v36, %s3581_s22  ;;  %v1809_v38 = vpop.f32.mrb[31].mxu1  ;;  %v2103_v36 = vld [vmem:[%s4681_s11 + $0x90] sm:$0xff] }
 0xa54   : > { %v1825_v39 = vrot.slane %v1809_v38, 7 }
 0xa56   : > { %v1828_v40 = vsel %vm1491_vm9, %v1825_v39, %v1827_v37  ;;  %v1826_v41 = vsel %vm1491_vm9, %v1823_v32, %v1825_v39  ;;  %v2102_v32 = vld [vmem:[%s4681_s11 + $0x88] sm:$0xff]  ;;  %v2104_v37 = vld [vmem:[%s4681_s11 + $0x98] sm:$0xff] }
 0xa57   : > { %1835 = vrot.lane.b32.xlu0 %v1828_v40, %s3581_s22  ;;  %1833 = vrot.lane.b32.xlu1 %v1826_v41, %s3581_s22  ;;  %v3420_v39 = vpack.c.bf16 %v2104_v37, %v2103_v36  ;;  %v2087_v40 = vld [vmem:[%s4681_s11 + $0x10] sm:$0xff]  ;;  %v2088_v41 = vld [vmem:[%s4681_s11 + $0x18] sm:$0xff] }
 0xa5b   : > { %2127 = vperm.xlu0 %3537, %v4098_v2  }
 0xa5f   : > { %2135 = vperm.xlu0 %3537, %v4115_v5  }
 0xa63   : > { %2139 = vperm.xlu0 %3537, %v4110_v25  }
 0xac4   : > { %v1830_v53 = vpop.permute.xlu1 %1829 }
 0xac5   : > { %v1841_v55 = vsel %vm1491_vm9, 0.0, %v1830_v53  ;;  %v1832_v42 = vpop.permute.xlu0 %1831  ;;  %v2105_v53 = vld [vmem:[%s4681_s11 + $0xa0] sm:$0xff] }
 0xac6   : > { %v1842_v43 = vadd.f32 %v1841_v55, %v1799_v33  ;;  %v1843_v44 = vadd.f32 %v3130_v31, %v1832_v42  ;;  %v2101_v31 = vld [vmem:[%s4681_s11 + $0x80] sm:$0xff]  ;;  %v3422_v55 = vpack.c.bf16 %v2088_v41, %v2087_v40 }
 0xac7   : > { %v2085_v33 = vld [vmem:[%s4681_s11] sm:$0xff]  ;;  %v3416_v34 = vpack.c.bf16 %v2102_v32, %v2101_v31 }
 0xac8   : > { %v1850_v45 = vadd.f32 %v2843_v54, %v1842_v43  ;;  %v1851_v46 = vadd.f32 %v2843_v54, %v1843_v44  ;;  %v2089_v43 = vld [vmem:[%s4681_s11 + $0x20] sm:$0xff]  ;;  %v2090_v44 = vld [vmem:[%s4681_s11 + $0x28] sm:$0xff] }
 0xac9   : > { %v1836_v47 = vpop.permute.xlu0 %1835  ;;  %v1834_v48 = vpop.permute.xlu1 %1833  ;;  %3417 = vmatprep.subr.bf16.mxu1 %v3416_v34 }
 0xaca   : > { %v1854_v49 = vmax.f32 %v1850_v45, 0.0  ;;  %v1855_v50 = vmax.f32 %v1851_v46, 0.0  ;;  %v1845_v51 = vadd.f32 %v3133_v35, %v1836_v47  ;;  %v1844_v52 = vadd.f32 %v1834_v48, %v1809_v38  ;;  %v2086_v35 = vld [vmem:[%s4681_s11 + $0x8] sm:$0xff]  ;;  %v2107_v45 = vld [vmem:[%s4681_s11 + $0xb0] sm:$0xff]  ;;  %v2108_v46 = vld [vmem:[%s4681_s11 + $0xb8] sm:$0xff] }
 0xacb   : > { %v3418_v38 = vpack.c.bf16 %v2086_v35, %v2085_v33  ;;  %v3426_v47 = vpack.c.bf16 %v2090_v44, %v2089_v43  ;;  %v3428_v48 = vpack.c.bf16 %v2108_v46, %v2107_v45 }
 0xacc   : > { %v1853_v56 = vadd.f32 %v2843_v54, %v1845_v51  ;;  %v1852_v57 = vadd.f32 %v2843_v54, %v1844_v52  ;;  %3142 = vmatprep.mubr.msk.f32.mxu1 %vm747_vm6, %v1854_v49  ;;  %v2106_v54 = vld [vmem:[%s4681_s11 + $0xa8] sm:$0xff]  ;;  %v2091_v49 = vld [vmem:[%s4681_s11 + $0x30] sm:$0xff]  ;;  %v2109_v51 = vld [vmem:[%s4681_s11 + $0xc0] sm:$0xff] }
 0xacd   : > { %3143 = vmatmul.mubr.msk.f32.vlgmr.msra.gmra.mrb[32].mxu1 %vm747_vm6, %v1855_v50  ;;  %v3424_v42 = vpack.c.bf16 %v2106_v54, %v2105_v53  ;;  %v2092_v50 = vld [vmem:[%s4681_s11 + $0x38] sm:$0xff]  ;;  %v2110_v52 = vld [vmem:[%s4681_s11 + $0xc8] sm:$0xff] }
 0xace   : > { %v1857_v58 = vmax.f32 %v1853_v56, 0.0  ;;  %v1856_v59 = vmax.f32 %v1852_v57, 0.0  ;;  %3419 = vmatpush3.bf16.msra.mxu1 %v3418_v38  ;;  %v3430_v56 = vpack.c.bf16 %v2092_v50, %v2091_v49  ;;  %v3432_v57 = vpack.c.bf16 %v2110_v52, %v2109_v51 }
 0xacf   : > { %3421 = vmatprep.subr.bf16.mxu1 %v3420_v39 }
 0xad0   : > { %3145 = vmatprep.mubr.msk.f32.mxu1 %vm747_vm6, %v1856_v59  ;;  %v2094_v59 = vld [vmem:[%s4681_s11 + $0x48] sm:$0xff] }
 0xad1   : > { %3146 = vmatmul.mubr.msk.f32.gmra.mrb[34].mxu1 %vm747_vm6, %v1857_v58  ;;  %v2093_v58 = vld [vmem:[%s4681_s11 + $0x40] sm:$0xff] }
 0xad2   : > { %3423 = vmatpush3.bf16.msra.mxu1 %v3422_v55 }
 0xad3   : > { %3425 = vmatprep.subr.bf16.mxu1 %v3424_v42 }
 0xad6   : > { %3427 = vmatpush3.bf16.msra.mxu1 %v3426_v47 }
 0xad7   : > { %3429 = vmatprep.subr.bf16.mxu1 %v3428_v48 }
 0xada   : > { %3431 = vmatpush3.bf16.msra.mxu1 %v3430_v56 }
 0xadb   : > { %3433 = vmatprep.subr.bf16.mxu1 %v3432_v57 }
 0xba0   : > { %v3144_v61 = vpop.f32.mrb[32].mxu1 }
 0xba1   : > { %v1941_v62 = vpop.f32.mrb[33].mxu1 }
 0xba2   : > { %v3408_v63 = vpack.c.bf16 %v3144_v61, %v1941_v62  ;;  %v2112_v61 = vld [vmem:[%s4681_s11 + $0xd8] sm:$0xff]  ;;  %v3434_v62 = vpack.c.bf16 %v2094_v59, %v2093_v58 }
 0xba4   : > { %v3147_v0 = vpop.f32.mrb[34].mxu1  ;;  %3409 = vmatprep.subr.bf16.mxu0 %v3408_v63  ;;  %3435 = vmatpush3.bf16.msra.mxu1 %v3434_v62 }
 0xba5   : > { %v1951_v4 = vpop.f32.mrb[35].mxu1  ;;  %3411 = vmatpush3.bf16.msra.mxu0 %v3408_v63  ;;  %v3436_v63 = vpack.c.bf16 %v2112_v61, %v2111_v60 }
 0xba6   : > { %v3412_v6 = vpack.c.bf16 %v3147_v0, %v1951_v4  ;;  %v2095_v0 = vld [vmem:[%s4681_s11 + $0x50] sm:$0xff]  ;;  %v2096_v4 = vld [vmem:[%s4681_s11 + $0x58] sm:$0xff] }
 0xba7   : > { %v3438_v12 = vpack.c.bf16 %v2096_v4, %v2095_v0  ;;  %3437 = vmatprep.subr.bf16.mxu1 %v3436_v63 }
 0xba8   : > { %3413 = vmatprep.subr.bf16.mxu0 %v3412_v6 }
 0xba9   : > { %3415 = vmatpush3.bf16.msra.mxu0 %v3412_v6  ;;  %v2113_v6 = vld [vmem:[%s4681_s11 + $0xe0] sm:$0xff]  ;;  %3439 = vmatpush3.bf16.msra.mxu1 %v3438_v12 }
 0xbaa   : > { %3449 = vmatprep.subr.bf16.mxu0 %v3448_v15 }
 0xbac   : > { %3157 = vmatmul.mubr.msk.f32.vlgmr.msra.gmra.mrb[16].mxu0 %vm747_vm6, %v4262_v22  ;;  %v3452_v22 = vpack.c.bf16 %v2120_v10, %v2119_v20  ;;  %v2116_v20 = vld [vmem:[%s4681_s11 + $0xf8] sm:$0xff] }
 0xbad   : > { %3159 = vmatprep.mubr.msk.f32.mxu0 %vm747_vm6, %v4267_v23  ;;  %3451 = vmatpush3.bf16.msra.mxu0 %v3448_v15  ;;  %v2097_v15 = vld [vmem:[%s4681_s11 + $0x60] sm:$0xff] }
 0xbae   : > { %3453 = vmatprep.subr.bf16.mxu0 %v3452_v22 }
 0xbb0   : > { %3160 = vmatmul.mubr.msk.f32.gmra.mrb[18].mxu0 %vm747_vm6, %v4276_v24 }
 0xbb1   : > { %3455 = vmatpush3.bf16.msra.mxu0 %v3452_v22  ;;  %v2852_v22 = vld [vmem:[%s4680_s10 + $0x20] ss:$0 sm:$0xff] }
 0xbb2   : > { %3457 = vmatprep.subr.bf16.mxu0 %v3456_v27 }
 0xbb5   : > { %3459 = vmatpush3.bf16.msra.mxu0 %v3456_v27 }
 0xbb6   : > { %3461 = vmatprep.subr.bf16.mxu0 %v3460_v30 }
 0xbb9   : > { %3463 = vmatpush3.bf16.msra.mxu0 %v3460_v30  ;;  %v2128_v30 = vpop.permute.xlu0 %2127 }
 0xbba   : > { %3464 = vmatprep.subr.bf16.mxu0 %v3574_v1 }
 0xbbd   : > { %v2136_v42 = vpop.permute.xlu0 %2135 }
 0xbc1   : > { %v2140_v63 = vpop.permute.xlu0 %2139 }
 0xc7f   : > { %v4312_v7 = vpop.f32.mrb[16].mxu0 }
 0xc80   : > { %v2050_v13 = vrot.slane %v4312_v7, 7  ;;  %v4321_v14 = vpop.f32.mrb[17].mxu0 }
 0xc81   : > { %v2049_v16 = vrot.slane %v4321_v14, 7 }
 0xc83   : > { %2056 = vrot.lane.b32.xlu1 %v2049_v16, %s3579_s30  ;;  %v4325_v17 = vpop.f32.mrb[18].mxu0  ;;  %v2051_v11 = vsel %vm1491_vm9, %v2049_v16, %v2050_v13  ;;  %v2098_v16 = vld [vmem:[%s4681_s11 + $0x68] sm:$0xff] }
 0xc84   : > { %v2054_v18 = vrot.slane %v4325_v17, 7  ;;  %v4329_v19 = vpop.f32.mrb[19].mxu0 }
 0xc85   : > { %v2052_v9 = vrot.slane %v4329_v19, 7 }
 0xc87   : > { %2131 = vperm.xlu1 %3538, %v4103_v3   ;;  %v2053_v23 = vsel %vm1491_vm9, %v2050_v13, %v2052_v9  ;;  %v2055_v24 = vsel %vm1491_vm9, %v2052_v9, %v2054_v18  ;;  %v3440_v13 = vpack.c.bf16 %v2114_v8, %v2113_v6  ;;  %v2115_v9 = vld [vmem:[%s4681_s11 + $0xf0] sm:$0xff] }
 0xc89   : > { %3441 = vmatprep.subr.bf16.mxu1 %v3440_v13  ;;  %v3583_v13 = vmov 2  }
 0xc8a   : > { %3559 = vset.pattern.permute.xlu0 %v3583_v13 }
 0xc8b   : > { %2058 = vrot.lane.b32.xlu1 %v2051_v11, %s3579_s30  ;;  %v3442_v11 = vpack.c.bf16 %v2098_v16, %v2097_v15 }
 0xc8d   : > { %3443 = vmatpush3.bf16.msra.mxu1 %v3442_v11  ;;  %v3584_v11 = vmov 3  }
 0xc8e   : > { %3560 = vset.pattern.permute.xlu1 %v3584_v11 }
 0xc8f   : > { %2060 = vrot.lane.b32.xlu1 %v2053_v23, %s3579_s30  ;;  %v3444_v23 = vpack.c.bf16 %v2116_v20, %v2115_v9 }
 0xc91   : > { %3445 = vmatprep.subr.bf16.mxu1 %v3444_v23 }
 0xc93   : > { %2062 = vrot.lane.b32.xlu1 %v2055_v24, %s3579_s30  ;;  %v2099_v24 = vld [vmem:[%s4681_s11 + $0x70] sm:$0xff] }
 0xc94   : > { %v3446_v27 = vpack.c.bf16 %v2100_v21, %v2099_v24 }
 0xc96   : > { %3447 = vmatpush3.bf16.msra.mxu1 %v3446_v27 }
 0xcf5   : > { %v2057_v18 = vpop.permute.xlu1 %2056 }
 0xcf6   : > { %v2068_v10 = vsel %vm1491_vm9, 0.0, %v2057_v18 }
 0xcf7   : > { %v2069_v26 = vadd.f32 %v2068_v10, %v4321_v14 }
 0xcf9   : > { %v2077_v28 = vadd.f32 %v2852_v22, %v2069_v26 }
 0xcfb   : > { %v2081_v29 = vmax.f32 %v2077_v28, 0.0 }
 0xcfd   : > { %v4458_v31 = vmul.f32 %v2128_v30, %v2081_v29 }
 0xcff   : > { %3178 = vmatprep.mubr.msk.f32.mxu0 %vm752_vm7, %v4458_v31  ;;  %v2163_v32 = vrot.slane %v4458_v31, 5  ;;  %v2184_v33 = vrot.slane %v4458_v31, 7  ;;  %v2172_v48 = vrot.slane %v4458_v31, 6 }
 0xd01   : > { %v2171_v34 = vsel %vm2162_vm11, 0.0, %v2163_v32  ;;  %v2192_v14 = vsel %vm1491_vm9, 0.0, %v2184_v33  ;;  %v2183_v30 = vsel %vm1478_vm10, 0.0, %v2172_v48 }
 0xd02   : > { %v3539_v35 = vpack.i.bf16 %v2171_v34, %v2192_v14 }
 0xd04   : > { %3540 = vrot.lane.b32.xlu0 %v3539_v35, %s3579_s30 }
 0xd06   : > { %v2132_v36 = vpop.permute.xlu1 %2131 }
 0xd0a   : > { %v2059_v37 = vpop.permute.xlu1 %2058 }
 0xd0b   : > { %v2070_v38 = vadd.f32 %v4312_v7, %v2059_v37  ;;  %v2150_v7 = vrot.slane %v4458_v31, 4 }
 0xd0d   : > { %v2078_v39 = vadd.f32 %v2852_v22, %v2070_v38 }
 0xd0e   : > { %v2061_v40 = vpop.permute.xlu1 %2060 }
 0xd0f   : > { %v2082_v41 = vmax.f32 %v2078_v39, 0.0  ;;  %v2071_v53 = vadd.f32 %v2061_v40, %v4329_v19 }
 0xd11   : > { %v2143_v54 = vmul.f32 %v2132_v36, %v2082_v41  ;;  %v2079_v55 = vadd.f32 %v2852_v22, %v2071_v53 }
 0xd12   : > { %v2063_v43 = vpop.permute.xlu1 %2062 }
 0xd13   : > { %v2083_v44 = vmax.f32 %v2079_v55, 0.0  ;;  %v2072_v45 = vadd.f32 %v4325_v17, %v2063_v43  ;;  %3179 = vmatmul.mubr.msk.f32.vlgmr.msra.gmra.mrb[20].mxu0 %vm752_vm7, %v2143_v54  ;;  %v2164_v46 = vrot.slane %v2143_v54, 5  ;;  %v2185_v47 = vrot.slane %v2143_v54, 7 }
 0xd14   : > { %v2173_v49 = vrot.slane %v2143_v54, 6  ;;  %v2151_v50 = vrot.slane %v2143_v54, 4 }
 0xd15   : > { %v2144_v51 = vmul.f32 %v2136_v42, %v2083_v44  ;;  %v2080_v52 = vadd.f32 %v2852_v22, %v2072_v45  ;;  %v2165_v19 = vsel %vm2162_vm11, %v2163_v32, %v2164_v46  ;;  %v2186_v56 = vsel %vm1491_vm9, %v2184_v33, %v2185_v47  ;;  %v2413_v45 = vld [vmem:[%s4682_s12] sm:$0xff] }
 0xd16   : > { %v3544_v57 = vpack.i.bf16 %v2165_v19, %v2186_v56  ;;  %v2174_v58 = vsel %vm1478_vm10, %v2172_v48, %v2173_v49  ;;  %v2152_v17 = vsel %vm593_vm2, %v2150_v7, %v2151_v50  ;;  %v2419_v19 = vld [vmem:[%s4682_s12 + $0x30] sm:$0xff]  ;;  %v2420_v56 = vld [vmem:[%s4682_s12 + $0x38] sm:$0xff] }
 0xd17   : > { %v2084_v59 = vmax.f32 %v2080_v52, 0.0  ;;  %3181 = vmatprep.mubr.msk.f32.mxu0 %vm752_vm7, %v2144_v51  ;;  %v2166_v60 = vrot.slane %v2144_v51, 5  ;;  %v2187_v61 = vrot.slane %v2144_v51, 7  ;;  %v2175_v62 = vrot.slane %v2144_v51, 6 }
 0xd18   : > { %3545 = vrot.lane.b32.xlu1 %v3544_v57, %s3579_s30  ;;  %v2153_v0 = vrot.slane %v2144_v51, 4  ;;  %v2418_v51 = vld [vmem:[%s4682_s12 + $0x28] sm:$0xff]  ;;  %v3474_v57 = vpack.c.bf16 %v2420_v56, %v2419_v19 }
 0xd19   : > { %v2145_v4 = vmul.f32 %v2140_v63, %v2084_v59  ;;  %v2167_v6 = vsel %vm2162_vm11, %v2164_v46, %v2166_v60  ;;  %v2188_v8 = vsel %vm1491_vm9, %v2185_v47, %v2187_v61  ;;  %v2176_v12 = vsel %vm1478_vm10, %v2173_v49, %v2175_v62  ;;  %v2414_v46 = vld [vmem:[%s4682_s12 + $0x8] sm:$0xff]  ;;  %v2415_v47 = vld [vmem:[%s4682_s12 + $0x10] sm:$0xff]  ;;  %v2425_v63 = vld [vmem:[%s4682_s12 + $0x60] sm:$0xff] }
 0xd1a   : > { %v3549_v15 = vpack.i.bf16 %v2167_v6, %v2188_v8  ;;  %v2154_v16 = vsel %vm593_vm2, %v2151_v50, %v2153_v0  ;;  %v3465_v48 = vpack.c.bf16 %v2414_v46, %v2413_v45  ;;  %v2417_v50 = vld [vmem:[%s4682_s12 + $0x20] sm:$0xff]  ;;  %v2427_v6 = vld [vmem:[%s4682_s12 + $0x70] sm:$0xff]  ;;  %v2428_v8 = vld [vmem:[%s4682_s12 + $0x78] sm:$0xff] }
 0xd1b   : > { %3182 = vmatmul.mubr.msk.f32.gmra.mrb[22].mxu0 %vm752_vm7, %v2145_v4  ;;  %v2168_v18 = vrot.slane %v2145_v4, 5  ;;  %v2189_v9 = vrot.slane %v2145_v4, 7  ;;  %v2177_v20 = vrot.slane %v2145_v4, 6  ;;  %v2155_v10 = vrot.slane %v2145_v4, 4 }
 0xd1c   : > { %3550 = vrot.lane.b32.xlu0 %v3549_v15, %s3579_s30  ;;  %3466 = vmatpush1.bf16.msra.mxu0 %v3465_v48  ;;  %v3471_v52 = vpack.c.bf16 %v2418_v51, %v2417_v50  ;;  %v2430_v15 = vld [vmem:[%s4682_s12 + $0x88] sm:$0xff] }
 0xd1d   : > { %v2169_v22 = vsel %vm2162_vm11, %v2166_v60, %v2168_v18  ;;  %v2190_v23 = vsel %vm1491_vm9, %v2187_v61, %v2189_v9  ;;  %v2178_v24 = vsel %vm1478_vm10, %v2175_v62, %v2177_v20  ;;  %v2156_v21 = vsel %vm593_vm2, %v2153_v0, %v2155_v10  ;;  %3467 = vmatprep.subr.bf16.mxu0 %v3574_v1  ;;  %v2423_v60 = vld [vmem:[%s4682_s12 + $0x50] sm:$0xff]  ;;  %v2424_v61 = vld [vmem:[%s4682_s12 + $0x58] sm:$0xff]  ;;  %v2426_v0 = vld [vmem:[%s4682_s12 + $0x68] sm:$0xff] }
 0xd1e   : > { %v3554_v26 = vpack.i.bf16 %v2169_v22, %v2190_v23  ;;  %v3480_v62 = vpack.c.bf16 %v2424_v61, %v2423_v60  ;;  %v3483_v4 = vpack.c.bf16 %v2426_v0, %v2425_v63  ;;  %v2432_v18 = vld [vmem:[%s4682_s12 + $0x98] sm:$0xff]  ;;  %v2433_v20 = vld [vmem:[%s4682_s12 + $0xa0] sm:$0xff]  ;;  %v2434_v10 = vld [vmem:[%s4682_s12 + $0xa8] sm:$0xff] }
 0xd1f   : > { %v3495_v22 = vpack.c.bf16 %v2434_v10, %v2433_v20  ;;  %v2435_v23 = vld [vmem:[%s4682_s12 + $0xb0] sm:$0xff] }
 0xd20   : > { %3555 = vrot.lane.b32.xlu1 %v3554_v26, %s3579_s30  ;;  %2455 = vperm.xlu0 %3559, %v4098_v2  }
 0xd24   : > { %2487 = vperm.xlu1 %3560, %v4098_v2   ;;  %3562 = vset.pattern.permute.xlu0 %v3584_v11  ;;  %v2161_v2 = vsel %vm593_vm2, 0.0, %v2150_v7  ;;  %v2416_v7 = vld [vmem:[%s4682_s12 + $0x18] sm:$0xff] }
 0xd25   : > { %2491 = vperm.xlu0 %3562, %v4103_v3   ;;  %v3468_v49 = vpack.c.bf16 %v2416_v7, %v2415_v47 }
 0xd27   : > { %3469 = vmatpush1.bf16.msra.mxu0 %v3468_v49 }
 0xd28   : > { %3561 = vset.pattern.permute.xlu1 %v3583_v13  ;;  %3470 = vmatprep.subr.bf16.mxu0 %v3574_v1 }
 0xd29   : > { %2459 = vperm.xlu1 %3561, %v4103_v3  }
 0xd2b   : > { %3472 = vmatpush1.bf16.msra.mxu0 %v3471_v52 }
 0xd2c   : > { %3473 = vmatprep.subr.bf16.mxu0 %v3574_v1 }
 0xd2d   : > { %2463 = vperm.xlu1 %3561, %v4115_v5  }
 0xd2f   : > { %3475 = vmatpush1.bf16.msra.mxu0 %v3474_v57 }
 0xd30   : > { %3476 = vmatprep.subr.bf16.mxu0 %v3574_v1 }
 0xd31   : > { %3563 = vset.pattern.permute.xlu1 %v3584_v11  ;;  %v2431_v11 = vld [vmem:[%s4682_s12 + $0x90] sm:$0xff] }
 0xd32   : > { %2495 = vperm.xlu1 %3563, %v4115_v5   ;;  %v3492_v9 = vpack.c.bf16 %v2432_v18, %v2431_v11 }
 0xd36   : > { %3564 = vset.pattern.permute.xlu1 %v3583_v13  ;;  %v2429_v13 = vld [vmem:[%s4682_s12 + $0x80] sm:$0xff] }
 0xd37   : > { %2467 = vperm.xlu1 %3564, %v4110_v25  }
 0xd76   : > { %v3541_v27 = vpop.permute.xlu0 %3540 }
 0xd77   : > { %v3543_v28 = vunpack.i.h.bf16 %v3541_v27  ;;  %v3542_v29 = vunpack.i.l.bf16 %v3541_v27  ;;  %v2853_v27 = vld [vmem:[%s4681_s11 + $0x140] ss:$0 sm:$0xff] }
 0xd79   : > { %v2223_v31 = vsel %vm752_vm7, %v2183_v30, %v3542_v29  ;;  %v2219_v32 = vsel %vm752_vm7, %v2161_v2, %v3543_v28 }
 0xd7a   : > { %2303 = vmatprep.mubr.f32.mxu1 %v2223_v31 }
 0xd7b   : > { %2304 = vmatmul.mubr.f32.vlgmr.msra.gmra.mrb[36].mxu1 %v2219_v32  ;;  %v3565_v32 = vld [vmem:[%s4673_s3 + $0x18] sm:$0xff] }
 0xd8a   : > { %v3546_v3 = vpop.permute.xlu1 %3545 }
 0xd8b   : > { %v3548_v33 = vunpack.i.h.bf16 %v3546_v3  ;;  %v3547_v34 = vunpack.i.l.bf16 %v3546_v3 }
 0xd8d   : > { %v2224_v5 = vsel %vm752_vm7, %v2174_v58, %v3547_v34  ;;  %v2220_v25 = vsel %vm752_vm7, %v2152_v17, %v3548_v33  ;;  %v2421_v58 = vld [vmem:[%s4682_s12 + $0x40] sm:$0xff]  ;;  %v2422_v17 = vld [vmem:[%s4682_s12 + $0x48] sm:$0xff] }
 0xd8e   : > { %v3551_v14 = vpop.permute.xlu0 %3550  ;;  %2308 = vmatprep.mubr.f32.mxu1 %v2224_v5  ;;  %v3477_v59 = vpack.c.bf16 %v2422_v17, %v2421_v58 }
 0xd8f   : > { %v3553_v35 = vunpack.i.h.bf16 %v3551_v14  ;;  %v3552_v36 = vunpack.i.l.bf16 %v3551_v14  ;;  %2309 = vmatmul.mubr.f32.gmra.mrb[38].mxu1 %v2220_v25 }
 0xd90   : > { %3478 = vmatpush1.bf16.msra.mxu0 %v3477_v59 }
 0xd91   : > { %v2225_v37 = vsel %vm752_vm7, %v2176_v12, %v3552_v36  ;;  %v2221_v38 = vsel %vm752_vm7, %v2154_v16, %v3553_v35  ;;  %3479 = vmatprep.subr.bf16.mxu0 %v3574_v1  ;;  %v3486_v12 = vpack.c.bf16 %v2428_v8, %v2427_v6  ;;  %v3489_v16 = vpack.c.bf16 %v2430_v15, %v2429_v13 }
 0xd92   : > { %v3556_v39 = vpop.permute.xlu1 %3555  ;;  %2313 = vmatprep.mubr.f32.mxu1 %v2225_v37 }
 0xd93   : > { %v3558_v40 = vunpack.i.h.bf16 %v3556_v39  ;;  %v3557_v41 = vunpack.i.l.bf16 %v3556_v39  ;;  %2314 = vmatmul.mubr.f32.gmra.mrb[40].mxu1 %v2221_v38 }
 0xd94   : > { %3481 = vmatpush1.bf16.msra.mxu0 %v3480_v62 }
 0xd95   : > { %v2226_v53 = vsel %vm752_vm7, %v2178_v24, %v3557_v41  ;;  %v2222_v54 = vsel %vm752_vm7, %v2156_v21, %v3558_v40  ;;  %3482 = vmatprep.subr.bf16.mxu0 %v3574_v1  ;;  %v2436_v24 = vld [vmem:[%s4682_s12 + $0xb8] sm:$0xff] }
 0xd96   : > { %2318 = vmatprep.mubr.f32.mxu1 %v2226_v53  ;;  %v3498_v21 = vpack.c.bf16 %v2436_v24, %v2435_v23 }
 0xd97   : > { %2319 = vmatmul.mubr.f32.gmra.mrb[42].mxu1 %v2222_v54 }
 0xd98   : > { %3484 = vmatpush1.bf16.msra.mxu0 %v3483_v4 }
 0xd99   : > { %3485 = vmatprep.subr.bf16.mxu0 %v3574_v1 }
 0xd9c   : > { %3487 = vmatpush1.bf16.msra.mxu0 %v3486_v12 }
 0xd9d   : > { %3488 = vmatprep.subr.bf16.mxu0 %v3574_v1 }
 0xda0   : > { %3490 = vmatpush1.bf16.msra.mxu0 %v3489_v16 }
 0xda1   : > { %3491 = vmatprep.subr.bf16.mxu0 %v3574_v1 }
 0xda3   : > { %v2488_v46 = vpop.permute.xlu1 %2487 }
 0xda4   : > { %3493 = vmatpush1.bf16.msra.mxu0 %v3492_v9 }
 0xda5   : > { %3494 = vmatprep.subr.bf16.mxu0 %v3574_v1 }
 0xda8   : > { %3496 = vmatpush1.bf16.msra.mxu0 %v3495_v22  ;;  %v2460_v62 = vpop.permute.xlu1 %2459 }
 0xda9   : > { %3497 = vmatprep.subr.bf16.mxu0 %v3574_v1 }
 0xdac   : > { %3499 = vmatpush1.bf16.msra.mxu0 %v3498_v21  ;;  %v2464_v8 = vpop.permute.xlu1 %2463 }
 0xdb1   : > { %v2496_v12 = vpop.permute.xlu1 %2495 }
 0xdb6   : > { %v2468_v13 = vpop.permute.xlu1 %2467 }
 0xde6   : > { %v4507_v55 = vpop.f32.mrb[20].mxu0 }
 0xde7   : > { %v4509_v42 = vpop.f32.mrb[21].mxu0 }
 0xdee   : > { %v4511_v43 = vpop.f32.mrb[22].mxu0 }
 0xdef   : > { %v4513_v44 = vpop.f32.mrb[23].mxu0 }
 0xe4e   : > { %v2982_v26 = vpop.f32.mrb[36].mxu1 }
 0xe4f   : > { %v2983_v28 = vpop.f32.mrb[37].mxu1 }
 0xe50   : > { %v2984_v29 = vadd.f32 %v2983_v28, %v2982_v26  ;;  %v2623_v28 = vld [vmem:[%s4683_s13] sm:$0xff] }
 0xe52   : > { %v2306_v30 = vadd.f32 %v2984_v29, %v2853_v27  ;;  %v2624_v29 = vld [vmem:[%s4683_s13 + $0x8] sm:$0xff] }
 0xe54   : > { %v2391_v2 = vadd.f32 %v4509_v42, %v2306_v30  ;;  %v2625_v30 = vld [vmem:[%s4683_s13 + $0x10] sm:$0xff] }
 0xe56   : > { %v2409_v31 = vmax.f32 %v2391_v2, 0.0  ;;  %v3500_v2 = vpack.c.bf16 %v2624_v29, %v2623_v28 }
 0xe58   : > { %2506 = vrot.lane.b32.xlu0 %v2409_v31, %s3579_s30  ;;  %v2442_v39 = vrot.slane %v2409_v31, 7  ;;  %v2474_v40 = vrot.slane %v2409_v31, 1  ;;  %v2626_v31 = vld [vmem:[%s4683_s13 + $0x18] sm:$0xff]  ;;  %3501 = vmatprep.subr.bf16.mxu1 %v3500_v2 }
 0xe59   : > { %3503 = vmatpush3.bf16.msra.mxu1 %v3500_v2 }
 0xe5a   : > { %v2453_v60 = vsel %vm1491_vm9, 0.0, %v2442_v39 }
 0xe5c   : > { %2499 = vperm.xlu0 %3562, %v3565_v32   ;;  %v3504_v32 = vpack.c.bf16 %v2626_v31, %v2625_v30 }
 0xe5e   : > { %3505 = vmatprep.subr.bf16.mxu1 %v3504_v32 }
 0xe5f   : > { %3507 = vmatpush3.bf16.msra.mxu1 %v3504_v32 }
 0xe62   : > { %v2985_v1 = vpop.f32.mrb[38].mxu1 }
 0xe63   : > { %v2986_v3 = vpop.f32.mrb[39].mxu1 }
 0xe64   : > { %v2987_v33 = vadd.f32 %v2986_v3, %v2985_v1  ;;  %v2627_v1 = vld [vmem:[%s4683_s13 + $0x20] sm:$0xff]  ;;  %v2628_v3 = vld [vmem:[%s4683_s13 + $0x28] sm:$0xff] }
 0xe66   : > { %v2311_v34 = vadd.f32 %v2987_v33, %v2853_v27  ;;  %v2988_v5 = vpop.f32.mrb[40].mxu1  ;;  %v3508_v33 = vpack.c.bf16 %v2628_v3, %v2627_v1 }
 0xe67   : > { %v2989_v25 = vpop.f32.mrb[41].mxu1 }
 0xe68   : > { %v2396_v14 = vadd.f32 %v4507_v55, %v2311_v34  ;;  %v2990_v35 = vadd.f32 %v2989_v25, %v2988_v5  ;;  %v2629_v34 = vld [vmem:[%s4683_s13 + $0x30] sm:$0xff]  ;;  %v2630_v5 = vld [vmem:[%s4683_s13 + $0x38] sm:$0xff]  ;;  %3509 = vmatprep.subr.bf16.mxu1 %v3508_v33 }
 0xe69   : > { %v3512_v25 = vpack.c.bf16 %v2630_v5, %v2629_v34  ;;  %3511 = vmatpush3.bf16.msra.mxu1 %v3508_v33 }
 0xe6a   : > { %v2410_v36 = vmax.f32 %v2396_v14, 0.0  ;;  %v2316_v37 = vadd.f32 %v2990_v35, %v2853_v27  ;;  %v2991_v38 = vpop.f32.mrb[42].mxu1  ;;  %v2858_v14 = vld [vmem:[%s4682_s12 + $0xc0] ss:$0 sm:$0xff] }
 0xe6b   : > { %v2992_v41 = vpop.f32.mrb[43].mxu1  ;;  %3513 = vmatprep.subr.bf16.mxu1 %v3512_v25 }
 0xe6c   : > { %v2475_v53 = vrot.slane %v2410_v36, 1  ;;  %v2401_v54 = vadd.f32 %v4513_v44, %v2316_v37  ;;  %v2443_v42 = vrot.slane %v2410_v36, 7  ;;  %v2993_v45 = vadd.f32 %v2992_v41, %v2991_v38  ;;  %2508 = vrot.lane.b32.xlu1 %v2410_v36, %s3579_s30 }
 0xe6d   : > { %3515 = vmatpush3.bf16.msra.mxu1 %v3512_v25 }
 0xe6e   : > { %v2476_v47 = vsel %vm520_vm0, %v2474_v40, %v2475_v53  ;;  %v2411_v48 = vmax.f32 %v2401_v54, 0.0  ;;  %v2444_v55 = vsel %vm1491_vm9, %v2442_v39, %v2443_v42  ;;  %v2321_v7 = vadd.f32 %v2993_v45, %v2853_v27 }
 0xe6f   : > { %v2502_v49 = vmul.f32 %v2488_v46, %v2476_v47  ;;  %v2471_v15 = vmul.f32 %v2460_v62, %v2444_v55  ;;  %v2863_v47 = vld [vmem:[%s4683_s13 + $0x40] ss:$0 sm:$0xff] }
 0xe70   : > { %v2406_v50 = vadd.f32 %v4511_v43, %v2321_v7  ;;  %v2445_v51 = vrot.slane %v2411_v48, 7  ;;  %2510 = vrot.lane.b32.xlu0 %v2411_v48, %s3579_s30  ;;  %v2477_v52 = vrot.slane %v2411_v48, 1  ;;  %v2456_v43 = vpop.permute.xlu0 %2455 }
 0xe71   : > { %2859 = vmatprep.mubr.msk.f32.mxu0 %vm752_vm7, %v2502_v49  ;;  %v2470_v63 = vmul.f32 %v2456_v43, %v2453_v60 }
 0xe72   : > { %v2412_v44 = vmax.f32 %v2406_v50, 0.0  ;;  %v2446_v19 = vsel %vm1491_vm9, %v2443_v42, %v2445_v51  ;;  %v2478_v56 = vsel %vm520_vm0, %v2475_v53, %v2477_v52 }
 0xe73   : > { %v2472_v20 = vmul.f32 %v2464_v8, %v2446_v19 }
 0xe74   : > { %v2479_v57 = vrot.slane %v2412_v44, 1  ;;  %2512 = vrot.lane.b32.xlu1 %v2412_v44, %s3579_s30  ;;  %v2447_v58 = vrot.slane %v2412_v44, 7  ;;  %v2492_v61 = vpop.permute.xlu0 %2491 }
 0xe75   : > { %v2503_v4 = vmul.f32 %v2492_v61, %v2478_v56 }
 0xe76   : > { %v2480_v17 = vsel %vm520_vm0, %v2477_v52, %v2479_v57  ;;  %v2448_v59 = vsel %vm1491_vm9, %v2445_v51, %v2447_v58  ;;  %v2485_v10 = vsel %vm520_vm0, %v2479_v57, 0.0 }
 0xe77   : > { %v2504_v18 = vmul.f32 %v2496_v12, %v2480_v17  ;;  %v2473_v21 = vmul.f32 %v2468_v13, %v2448_v59 }
 0xeca   : > { %v2507_v0 = vpop.permute.xlu0 %2506 }
 0xecb   : > { %v2518_v6 = vsel %vm752_vm7, %v2470_v63, %v2507_v0 }
 0xecc   : > { %2603 = vmatmul.mubr.f32.vlgmr.msra.gmra.mrb[24].mxu0 %v2518_v6 }
 0xecd   : > { %2860 = vmatprep.mubr.msk.f32.mxu0 %vm752_vm7, %v2503_v4 }
 0xedb   : > { %v2500_v16 = vpop.permute.xlu0 %2499 }
 0xedc   : > { %v2505_v23 = vmul.f32 %v2500_v16, %v2485_v10 }
 0xede   : > { %v2509_v11 = vpop.permute.xlu1 %2508 }
 0xedf   : > { %v2519_v9 = vsel %vm752_vm7, %v2471_v15, %v2509_v11 }
 0xee0   : > { %2608 = vmatmul.mubr.f32.gmra.mrb[26].mxu0 %v2519_v9 }
 0xee1   : > { %2861 = vmatprep.mubr.msk.f32.mxu0 %vm752_vm7, %v2504_v18 }
 0xee2   : > { %v2511_v22 = vpop.permute.xlu0 %2510 }
 0xee3   : > { %v2520_v24 = vsel %vm752_vm7, %v2472_v20, %v2511_v22 }
 0xee4   : > { %2613 = vmatmul.mubr.f32.gmra.mrb[28].mxu0 %v2520_v24 }
 0xee5   : > { %2862 = vmatprep.mubr.msk.f32.mxu0 %vm752_vm7, %v2505_v23 }
 0xee6   : > { %v2513_v26 = vpop.permute.xlu1 %2512 }
 0xee7   : > { %v2521_v27 = vsel %vm752_vm7, %v2473_v21, %v2513_v26 }
 0xee8   : > { %2618 = vmatmul.mubr.f32.gmra.mrb[30].mxu0 %v2521_v27 }
 0xf9f   : > { %v2604_v35 = vpop.f32.mrb[24].mxu0 }
 0xfa0   : > { %v2605_v36 = vadd.f32 %v2858_v14, %v2604_v35  ;;  %v2606_v37 = vpop.f32.mrb[25].mxu0 }
 0xfa2   : > { %3200 = vmatprep.mubr.msk.f32.mxu1 %vm752_vm7, %v2605_v36 }
 0xfb3   : > { %v2609_v38 = vpop.f32.mrb[26].mxu0 }
 0xfb4   : > { %v2610_v39 = vadd.f32 %v2858_v14, %v2609_v38  ;;  %v2611_v40 = vpop.f32.mrb[27].mxu0 }
 0xfb6   : > { %3201 = vmatmul.mubr.msk.f32.vlgmr.msra.gmra.mrb[44].mxu1 %vm752_vm7, %v2610_v39 }
 0xfb7   : > { %v2614_v41 = vpop.f32.mrb[28].mxu0 }
 0xfb8   : > { %v2615_v53 = vadd.f32 %v2858_v14, %v2614_v41  ;;  %v2616_v54 = vpop.f32.mrb[29].mxu0 }
 0xfba   : > { %3203 = vmatprep.mubr.msk.f32.mxu1 %vm752_vm7, %v2615_v53 }
 0xfbb   : > { %v2619_v42 = vpop.f32.mrb[30].mxu0 }
 0xfbc   : > { %v2620_v45 = vadd.f32 %v2858_v14, %v2619_v42  ;;  %v2621_v46 = vpop.f32.mrb[31].mxu0 }
 0xfbe   : > { %3204 = vmatmul.mubr.msk.f32.gmra.mrb[46].mxu1 %vm752_vm7, %v2620_v45 }
0x1089   : > { %v3202_v48 = vpop.f32.mrb[44].mxu1 }
0x108a   : > { %v2714_v55 = vpop.f32.mrb[45].mxu1  ;;  %v2720_v49 = vadd.f32 %v3202_v48, %v2863_v47 }
0x108b   : > { %v2715_v7 = vadd.f32 %v2863_v47, %v2714_v55 }
0x108c   : > { %2734 = vst [vmem:[%s469_s17 + $0x8] sm:$0xff] %v2720_v49 }
0x108d   : > { %2733 = vst [vmem:[%s469_s17] sm:$0xff] %v2715_v7 }
0x1091   : > { %v3205_v50 = vpop.f32.mrb[46].mxu1 }
0x1092   : > { %v2724_v51 = vpop.f32.mrb[47].mxu1  ;;  %v2730_v44 = vadd.f32 %v3205_v50, %v2863_v47 }
0x1093   : > { %v2725_v52 = vadd.f32 %v2863_v47, %v2724_v51 }
0x1094   : > { %2736 = vst [vmem:[%s469_s17 + $0x18] sm:$0xff] %v2730_v44 }
0x1095   : > { %2735 = vst [vmem:[%s469_s17 + $0x10] sm:$0xff] %v2725_v52 }
0x1096 PF: > { %s24_s29 = sadd.s32 1, %s3572_s29  }
0x1097   : > { %p21_p4 = scmp.ge.s32.totalorder %s24_s29, 4  }
0x1099   :  { %23 = sbr.rel (!%p21_p4) target bundleno = 1 (0x1), region = 106 }

</bundles_post_ra>
